<compile_context>
chip_gen: v7x
topology: tpu7x:2x2x1
jax: 0.10.0
libtpu: 0.0.40
codegen_flags: <defaults>
</compile_context>

<pallas_src>
import functools
import math

import jax
import jax.numpy as jnp
import numpy as np
from jax.experimental import pallas as pl
from jax.experimental.pallas import tpu as pltpu


def _anomaly_attention_kernel(q_ref, kt_ref, v_ref, sigma_ref,   # inputs
                              z_ref, p_ref,                      # outputs
                              *, N, N_pad, block_q):
    qi = pl.program_id(1)
    row0 = qi * block_q

    ii = jax.lax.broadcasted_iota(jnp.int32, (block_q, N_pad), 0) + row0
    jj = jax.lax.broadcasted_iota(jnp.int32, (block_q, N_pad), 1)

    # ---- series association: softmax(Q K^T / sqrt(D)); 1/sqrt(D) is already
    #      folded into Q by the wrapper.  K arrives pre-transposed (D, N).
    scores = jnp.dot(q_ref[0], kt_ref[0],                        # (tq, N_pad) f32
                     preferred_element_type=jnp.float32)
    if N_pad != N:                                               # mask padded cols
        scores = jnp.where(jj < N, scores, -jnp.inf)
    scores = scores - jnp.max(scores, axis=-1, keepdims=True)
    e = jnp.exp(scores)
    s = e * pl.reciprocal(jnp.sum(e, axis=-1, keepdims=True), approx=True)

    # ---- reconstruction: Z = S V ----
    z = jnp.dot(s.astype(jnp.bfloat16), v_ref[0],                # (tq, D) f32
                preferred_element_type=jnp.float32)
    z_ref[0] = z.astype(z_ref.dtype)

    # ---- prior association: row-normalized gaussian of |i - j| ----
    # The 1/(sqrt(2*pi)*|sigma|) factor is constant along each row and cancels
    # exactly in the row normalization, so it is never computed.
    inv_sigma = pl.reciprocal(sigma_ref[0])                      # exact, (tq, 1)
    dist = jnp.abs(ii - jj).astype(jnp.float32)                  # (tq, N_pad)
    g = jnp.exp(-0.5 * jnp.square(dist * inv_sigma))
    if N_pad != N:                                               # kill padded cols
        g = jnp.where(jj < N, g, 0.0)
    p = g * pl.reciprocal(jnp.sum(g, axis=-1, keepdims=True), approx=False)
    p_ref[0] = p.astype(p_ref.dtype)


def _round_up(a, b):
    return (a + b - 1) // b * b


def anomaly_attention(x, wq, wk, wv, ws, *, block_q=128, p_dtype=jnp.bfloat16):
    """x: (B, N, d_model); wq/wk/wv: (d_model, d_model); ws: (1, d_model).

    Weights follow the PyTorch nn.Linear convention (out_features, in_features).
    Returns (Z, P) with Z: (B, N, d_model) f32, P: (B, N, N) p_dtype.
    """
    B, N, D = x.shape
    x = x.astype(jnp.float32)

    tq = min(block_q, _round_up(N, 8))
    assert tq % 8 == 0, "block_q must be a multiple of 8"
    N_pad = _round_up(N, tq)
    n_q = N_pad // tq

    # ---- projections + sigma in XLA (full MXU rate), bf16 kernel inputs ----
    scale = 1.0 / math.sqrt(D)
    wq32, wk32, wv32, ws32 = (w.astype(jnp.float32) for w in (wq, wk, wv, ws))
    q = (jnp.einsum('bnd,ed->bne', x, wq32) * scale).astype(jnp.bfloat16)  # (B,N,D)
    kT = jnp.einsum('bnd,ed->ben', x, wk32).astype(jnp.bfloat16)           # (B,D,N)
    v = jnp.einsum('bnd,ed->bne', x, wv32).astype(jnp.bfloat16)            # (B,N,D)
    sigma = jnp.einsum('bnd,od->bno', x, ws32)                             # (B,N,1) f32

    if N_pad != N:
        pad = N_pad - N
        q = jnp.pad(q, ((0, 0), (0, pad), (0, 0)))
        kT = jnp.pad(kT, ((0, 0), (0, 0), (0, pad)))
        v = jnp.pad(v, ((0, 0), (0, pad), (0, 0)))
        sigma = jnp.pad(sigma, ((0, 0), (0, pad), (0, 0)))

    # ---- VMEM budget: double-buffered blocks + outputs, capped below physical.
    p_bytes = jnp.dtype(p_dtype).itemsize
    est = 2 * (tq * D * 2            # Q tile (bf16)
               + D * N_pad * 2       # K^T    (bf16)
               + N_pad * D * 2       # V      (bf16)
               + tq * 128 * 4        # sigma tile (f32, lane-padded)
               + tq * D * 4          # Z tile (f32)
               + tq * N_pad * p_bytes)  # P row-block
    try:
        vmem_cap = pltpu.get_tpu_info().vmem_capacity_bytes
    except Exception:
        vmem_cap = 64 * 1024 * 1024          # conservative (v7x per-TC)
    vmem_limit = int(min(max(int(est * 1.5), 32 * 1024 * 1024),
                         int(vmem_cap * 0.75)))

    kernel = functools.partial(_anomaly_attention_kernel,
                               N=N, N_pad=N_pad, block_q=tq)

    z, p = pl.pallas_call(
        kernel,
        out_shape=(
            jax.ShapeDtypeStruct((B, N_pad, D), jnp.float32),        # Z
            jax.ShapeDtypeStruct((B, N_pad, N_pad), p_dtype),        # P
        ),
        grid=(B, n_q),
        in_specs=[
            pl.BlockSpec((1, tq, D), lambda b, i: (b, i, 0)),        # Q tile
            pl.BlockSpec((1, D, N_pad), lambda b, i: (b, 0, 0)),     # K^T (per batch)
            pl.BlockSpec((1, N_pad, D), lambda b, i: (b, 0, 0)),     # V   (per batch)
            pl.BlockSpec((1, tq, 1), lambda b, i: (b, i, 0)),        # sigma tile
        ],
        out_specs=(
            pl.BlockSpec((1, tq, D), lambda b, i: (b, i, 0)),        # Z tile
            pl.BlockSpec((1, tq, N_pad), lambda b, i: (b, i, 0)),    # P row-block
        ),
        compiler_params=pltpu.CompilerParams(
            # No cross-tile state -> both axes parallel (uses both v7x TCs).
            dimension_semantics=("parallel", "parallel"),
            vmem_limit_bytes=vmem_limit),
    )(q, kT, v, sigma)

    if N_pad != N:
        z = z[:, :N, :]
        p = p[:, :N, :N]
    return z, p


def _reference(x, wq, wk, wv, ws):
    """Plain-JAX f32 reference mirroring the PyTorch forward exactly."""
    D = x.shape[-1]
    N = x.shape[-2]
    q = x @ wq.T
    k = x @ wk.T
    v = x @ wv.T
    sigma = x @ ws.T                                                 # (B, N, 1)
    s = jax.nn.softmax(q @ jnp.swapaxes(k, 1, 2) / math.sqrt(D), axis=-1)
    z = s @ v
    idx = np.indices((N, N))
    dist = jnp.asarray(np.abs(idx[0] - idx[1]), dtype=jnp.float32)   # (N, N)
    g = (1.0 / (jnp.sqrt(2.0 * jnp.pi) * jnp.abs(sigma))
         * jnp.exp(-0.5 * jnp.square(dist / sigma)))
    p = g / jnp.sum(g, axis=-1, keepdims=True)
    return z, p


if __name__ == "__main__":
    # Small but lane-dense shapes (D and N multiples of 128 -> unmasked stores).
    B, N, D = 2, 256, 128

    key = jax.random.PRNGKey(0)
    kx, kq, kk, kv, ks = jax.random.split(key, 5)

    # nn.Linear default init: U(-1/sqrt(in_features), 1/sqrt(in_features)).
    bound = 1.0 / math.sqrt(D)
    x = jax.random.normal(kx, (B, N, D), dtype=jnp.float32)
    wq = jax.random.uniform(kq, (D, D), jnp.float32, -bound, bound)
    wk = jax.random.uniform(kk, (D, D), jnp.float32, -bound, bound)
    wv = jax.random.uniform(kv, (D, D), jnp.float32, -bound, bound)
    ws = jax.random.uniform(ks, (1, D), jnp.float32, -bound, bound)

    z, p = anomaly_attention(x, wq, wk, wv, ws)
    jax.block_until_ready((z, p))

    z_ref, p_ref = _reference(x, wq, wk, wv, ws)
    # Z goes through bf16 MXU inputs (f32 accumulation) -> loose tolerance.
    np.testing.assert_allclose(np.asarray(z), np.asarray(z_ref),
                               rtol=2e-2, atol=2e-2)
    # P math is f32 (VPU/EUP), stored bf16 -> ~0.4% relative rounding.
    np.testing.assert_allclose(np.asarray(p, dtype=np.float32),
                               np.asarray(p_ref),
                               rtol=2e-2, atol=2e-3)

    print("KERNEL_OK")
</pallas_src>

<mosaic_0001>
module attributes {stable_mosaic.version = 11 : i64} {
  func.func @_anomaly_attention_kernel(%arg0: i32, %arg1: i32, %arg2: memref<1x128x128xbf16, #tpu.memory_space<vmem>>, %arg3: memref<1x128x256xbf16, #tpu.memory_space<vmem>>, %arg4: memref<1x256x128xbf16, #tpu.memory_space<vmem>>, %arg5: memref<1x128x1xf32, #tpu.memory_space<vmem>>, %arg6: memref<1x128x128xf32, #tpu.memory_space<vmem>>, %arg7: memref<1x128x256xbf16, #tpu.memory_space<vmem>>) attributes {dimension_semantics = [#tpu.dimension_semantics<parallel>, #tpu.dimension_semantics<parallel>], iteration_bounds = array<i64: 2, 2>, scalar_prefetch = 0 : i64, scratch_operands = 0 : i64, tpu.core_type = #tpu.core_type<tc>, window_params = [{transform_indices = @transform_0, window_bounds = array<i64: 1, 128, 128>}, {transform_indices = @transform_1, window_bounds = array<i64: 1, 128, 256>}, {transform_indices = @transform_2, window_bounds = array<i64: 1, 256, 128>}, {transform_indices = @transform_3, window_bounds = array<i64: 1, 128, 1>}, {transform_indices = @transform_4, window_bounds = array<i64: 1, 128, 128>}, {transform_indices = @transform_5, window_bounds = array<i64: 1, 128, 256>}]} {
    %c128_i32 = arith.constant 128 : i32
    %0 = arith.muli %arg1, %c128_i32 : i32
    %1 = tpu.iota {dimensions = array<i32: 0>} : vector<128x256xi32>
    %2 = vector.broadcast %0 : i32 to vector<128x256xi32>
    %3 = arith.addi %1, %2 : vector<128x256xi32>
    %4 = tpu.iota {dimensions = array<i32: 1>} : vector<128x256xi32>
    %c0 = arith.constant 0 : index
    %c0_0 = arith.constant 0 : index
    %c0_1 = arith.constant 0 : index
    %5 = vector.load %arg2[%c0, %c0_0, %c0_1] : memref<1x128x128xbf16, #tpu.memory_space<vmem>>, vector<1x128x128xbf16>
    %6 = vector.shape_cast %5 : vector<1x128x128xbf16> to vector<128x128xbf16>
    %c0_2 = arith.constant 0 : index
    %c0_3 = arith.constant 0 : index
    %c0_4 = arith.constant 0 : index
    %7 = vector.load %arg3[%c0_2, %c0_3, %c0_4] : memref<1x128x256xbf16, #tpu.memory_space<vmem>>, vector<1x128x256xbf16>
    %8 = vector.shape_cast %7 : vector<1x128x256xbf16> to vector<128x256xbf16>
    %cst = arith.constant dense<0.000000e+00> : vector<128x256xf32>
    %9 = tpu.matmul %6, %8, %cst {dimension_numbers = #tpu.dot_dimension_numbers<[1], [0], [0], [1], [0, 0, 1, 1], [], []>} : vector<128x128xbf16>, vector<128x256xbf16>, vector<128x256xf32> -> vector<128x256xf32>
    %cst_5 = arith.constant dense<0xFF800000> : vector<128xf32>
    %10 = vector.multi_reduction <maximumf>, %9, %cst_5 [1] : vector<128x256xf32> to vector<128xf32>
    %11 = vector.shape_cast %10 : vector<128xf32> to vector<128x1xf32>
    %12 = vector.broadcast %11 : vector<128x1xf32> to vector<128x256xf32>
    %13 = arith.subf %9, %12 : vector<128x256xf32>
    %14 = math.exp %13 : vector<128x256xf32>
    %cst_6 = arith.constant dense<0.000000e+00> : vector<128xf32>
    %15 = vector.multi_reduction <add>, %14, %cst_6 [1] : vector<128x256xf32> to vector<128xf32>
    %16 = vector.shape_cast %15 : vector<128xf32> to vector<128x1xf32>
    %17 = tpu.reciprocal %16 {approx = true} : vector<128x1xf32> -> vector<128x1xf32>
    %18 = vector.broadcast %17 : vector<128x1xf32> to vector<128x256xf32>
    %19 = arith.mulf %14, %18 : vector<128x256xf32>
    %20 = arith.truncf %19 : vector<128x256xf32> to vector<128x256xbf16>
    %c0_7 = arith.constant 0 : index
    %c0_8 = arith.constant 0 : index
    %c0_9 = arith.constant 0 : index
    %21 = vector.load %arg4[%c0_7, %c0_8, %c0_9] : memref<1x256x128xbf16, #tpu.memory_space<vmem>>, vector<1x256x128xbf16>
    %22 = vector.shape_cast %21 : vector<1x256x128xbf16> to vector<256x128xbf16>
    %cst_10 = arith.constant dense<0.000000e+00> : vector<128x128xf32>
    %23 = tpu.matmul %20, %22, %cst_10 {dimension_numbers = #tpu.dot_dimension_numbers<[1], [0], [0], [1], [0, 0, 1, 1], [], []>} : vector<128x256xbf16>, vector<256x128xbf16>, vector<128x128xf32> -> vector<128x128xf32>
    %c0_11 = arith.constant 0 : index
    %c0_12 = arith.constant 0 : index
    %c0_13 = arith.constant 0 : index
    %24 = vector.load %arg6[%c0_11, %c0_12, %c0_13] : memref<1x128x128xf32, #tpu.memory_space<vmem>>, vector<1x128x128xf32>
    %25 = vector.shape_cast %24 : vector<1x128x128xf32> to vector<128x128xf32>
    %26 = vector.shape_cast %23 : vector<128x128xf32> to vector<1x128x128xf32>
    tpu.vector_store %arg6[%c0_11, %c0_12, %c0_13], %26 {strides = array<i32>} : memref<1x128x128xf32, #tpu.memory_space<vmem>>, vector<1x128x128xf32>,
    %c0_14 = arith.constant 0 : index
    %c0_15 = arith.constant 0 : index
    %c0_16 = arith.constant 0 : index
    %27 = vector.load %arg5[%c0_14, %c0_15, %c0_16] : memref<1x128x1xf32, #tpu.memory_space<vmem>>, vector<1x128x1xf32>
    %28 = vector.shape_cast %27 : vector<1x128x1xf32> to vector<128x1xf32>
    %29 = tpu.reciprocal %28 : vector<128x1xf32> -> vector<128x1xf32>
    %30 = arith.subi %3, %4 : vector<128x256xi32>
    %31 = math.absi %30 : vector<128x256xi32>
    %32 = arith.sitofp %31 : vector<128x256xi32> to vector<128x256xf32>
    %33 = vector.broadcast %29 : vector<128x1xf32> to vector<128x256xf32>
    %34 = arith.mulf %32, %33 : vector<128x256xf32>
    %35 = arith.mulf %34, %34 : vector<128x256xf32>
    %cst_17 = arith.constant -5.000000e-01 : f32
    %36 = vector.broadcast %cst_17 : f32 to vector<128x256xf32>
    %37 = arith.mulf %36, %35 : vector<128x256xf32>
    %38 = math.exp %37 : vector<128x256xf32>
    %cst_18 = arith.constant dense<0.000000e+00> : vector<128xf32>
    %39 = vector.multi_reduction <add>, %38, %cst_18 [1] : vector<128x256xf32> to vector<128xf32>
    %40 = vector.shape_cast %39 : vector<128xf32> to vector<128x1xf32>
    %41 = tpu.reciprocal %40 : vector<128x1xf32> -> vector<128x1xf32>
    %42 = vector.broadcast %41 : vector<128x1xf32> to vector<128x256xf32>
    %43 = arith.mulf %38, %42 : vector<128x256xf32>
    %44 = arith.truncf %43 : vector<128x256xf32> to vector<128x256xbf16>
    %c0_19 = arith.constant 0 : index
    %c0_20 = arith.constant 0 : index
    %c0_21 = arith.constant 0 : index
    %45 = vector.load %arg7[%c0_19, %c0_20, %c0_21] : memref<1x128x256xbf16, #tpu.memory_space<vmem>>, vector<1x128x256xbf16>
    %46 = vector.shape_cast %45 : vector<1x128x256xbf16> to vector<128x256xbf16>
    %47 = vector.shape_cast %44 : vector<128x256xbf16> to vector<1x128x256xbf16>
    tpu.vector_store %arg7[%c0_19, %c0_20, %c0_21], %47 {strides = array<i32>} : memref<1x128x256xbf16, #tpu.memory_space<vmem>>, vector<1x128x256xbf16>,
    return
  }
  func.func @transform_0(%arg0: i32, %arg1: i32) -> (i32, i32, i32) {
    %c0_i32 = arith.constant 0 : i32
    %c0_i32_0 = arith.constant 0 : i32
    return %arg0, %arg1, %c0_i32 : i32, i32, i32
  }
  func.func @transform_1(%arg0: i32, %arg1: i32) -> (i32, i32, i32) {
    %c0_i32 = arith.constant 0 : i32
    %c0_i32_0 = arith.constant 0 : i32
    %c0_i32_1 = arith.constant 0 : i32
    return %arg0, %c0_i32, %c0_i32_0 : i32, i32, i32
  }
  func.func @transform_2(%arg0: i32, %arg1: i32) -> (i32, i32, i32) {
    %c0_i32 = arith.constant 0 : i32
    %c0_i32_0 = arith.constant 0 : i32
    %c0_i32_1 = arith.constant 0 : i32
    return %arg0, %c0_i32, %c0_i32_0 : i32, i32, i32
  }
  func.func @transform_3(%arg0: i32, %arg1: i32) -> (i32, i32, i32) {
    %c0_i32 = arith.constant 0 : i32
    %c0_i32_0 = arith.constant 0 : i32
    return %arg0, %arg1, %c0_i32 : i32, i32, i32
  }
  func.func @transform_4(%arg0: i32, %arg1: i32) -> (i32, i32, i32) {
    %c0_i32 = arith.constant 0 : i32
    %c0_i32_0 = arith.constant 0 : i32
    return %arg0, %arg1, %c0_i32 : i32, i32, i32
  }
  func.func @transform_5(%arg0: i32, %arg1: i32) -> (i32, i32, i32) {
    %c0_i32 = arith.constant 0 : i32
    %c0_i32_0 = arith.constant 0 : i32
    return %arg0, %arg1, %c0_i32 : i32, i32, i32
  }
}

</mosaic_0001>

<bundles_post_ra>
// kernel: tpu_custom_call.1
= control target key start
LH: loop header
LB: loop body
LE: loop exit
PB: predicated region body
PF: predicated region fallthrough
CT: control target
= control target key end

     0   :  { %11 = vsyncpa [#allocation3], 0  ;;  %s3864_s0 = inlined_call_operand.vmem [shape: bf16[2,256,128], index: 0, kind: input, shape index: {}]   ;;  %s3865_s1 = inlined_call_operand.vmem [shape: bf16[2,128,256], index: 1, kind: input, shape index: {}]   ;;  %s3866_s2 = inlined_call_operand.hbm [shape: bf16[2,256,128], index: 2, kind: input, shape index: {}]   ;;  %s3867_s3 = inlined_call_operand.vmem [shape: f32[2,256,1], index: 3, kind: input, shape index: {}]   ;;  %s3868_s4 = inlined_call_operand.hbm [shape: f32[2,256,128], index: 4, kind: output, shape index: {0}]   ;;  %s3869_s5 = inlined_call_operand.hbm [shape: bf16[2,256,256], index: 5, kind: output, shape index: {1}]  }
   0x1   :  { %13 = vsyncpa [#allocation3 + $0x1], 0 }
   0x2   :  { %14 = vsyncpa [#allocation4], 0 }
   0x3   :  { %16 = vsyncpa [#allocation4 + $0x1], 0 }
   0x4   :  { %17 = vsyncpa [#allocation7], 0 }
   0x5   :  { %19 = vsyncpa [#allocation7 + $0x1], 0  ;;  %s2835_s18 = smov 0   ;;  %s2837_s19 = smov 0  }
   0x6   :  { %s2839_s20 = smov 0   ;;  %s2841_s21 = smov 0  }
   0x7   :  { %s2843_s22 = smov 0   ;;  %s2845_s23 = smov 0  }
   0x8   :  { %s2847_s24 = smov 0   ;;  %s2849_s25 = smov 0  }
   0x9   :  { %s2851_s26 = smov 0   ;;  %s2853_s27 = smov 0  }
   0xa   :  { %s2855_s28 = smov 0  }
   0xb LB: > { %3875 = sst [smem:[#allocation11_spill]] %s2791_s27  ;;  %s2023_s29 = sadd.s32 4294967295, %s2795_s28   ;;  %s2795_s28 = sphi %s2855_s28, %s25_s28   ;;  %s2791_s27 = sphi %s2853_s27, %s3910_s27   ;;  %s2787_s26 = sphi %s2851_s26, %s3918_s26   ;;  %s2783_s25 = sphi %s2849_s25, %s3908_s25   ;;  %s2779_s24 = sphi %s2847_s24, %s3917_s24   ;;  %s2775_s23 = sphi %s2845_s23, %s3916_s23   ;;  %s2771_s22 = sphi %s2843_s22, %s3915_s22   ;;  %s2767_s21 = sphi %s2841_s21, %s3914_s21   ;;  %s2763_s20 = sphi %s2839_s20, %s3913_s20   ;;  %s2759_s19 = sphi %s2837_s19, %s3912_s19   ;;  %s2755_s18 = sphi %s2835_s18, %s3911_s18  }
   0xc   : > { %s2024_s30 = sadd.s32 4294967294, %s2795_s28   ;;  %s34_s6 = sadd.s32 1, %s2787_s26 }
   0xd   : > { %s37_s7 = sadd.s32 1, %s2791_s27  ;;  %p35_p0 = scmp.ge.s32.totalorder %s34_s6, 2 }
   0xe   : > { %s98_s8 = sadd.s32 1, %s2775_s23  ;;  %p105_p1 = scmp.ne.s32.totalorder %s2775_s23, %s2771_s22 }
   0xf   : > { %p106_p2 = scmp.eq.s32.totalorder %s2795_s28, 0  ;;  %s3920_s6 = smov (%p35_p0, %s34_s6), 0 }
  0x10   : > { %3876 = sst [smem:[#allocation12_spill]] %s3920_s6  ;;  %s3922_s7 = smov (!%p35_p0, %s37_s7), %s2791_s27 }
  0x11   : > { %p2899_p3 = por %p106_p2, %p105_p1  ;;  %p111_p4 = scmp.ne.s32.totalorder %s2771_s22, %s2767_s21 }
  0x12   : > { %p39_p5 = scmp.ge.s32.totalorder %s3922_s7, 2  ;;  %p112_p6 = scmp.eq.s32.totalorder %s2023_s29, 0 }
  0x13   : > { %s150_s10 = ssub.s32 %s2787_s26, %s3920_s6  ;;  %s154_s11 = sadd.s32 1, %s2763_s20 }
  0x14   : > { %s3924_s7 = smov (%p39_p5, %s3922_s7), 0  ;;  %p2909_p7 = por %p112_p6, %p111_p4 }
  0x15   : > { %3878 = sst [smem:[#allocation13_spill]] %s3924_s7  ;;  %p164_p8 = scmp.ne.s32.totalorder %s2763_s20, %s2759_s19 }
  0x16   : > { %s95_s13 = ssub.s32 %s2791_s27, %s3924_s7  ;;  %p165_p9 = scmp.eq.s32.totalorder %s2023_s29, 3 }
  0x17   : > { %p96_p10 = scmp.eq.s32.totalorder %s95_s13, 0  ;;  %s151_s14 = sor.u32 %s150_s10, %s95_s13 }
  0x18   : > { %p152_p11 = scmp.eq.s32.totalorder %s151_s14, 0  ;;  %p2917_p12 = por %p165_p9, %p164_p8 }
  0x19   : > { %s2922_s16 = scalar_select %p96_p10, %s2775_s23, %s98_s8  }
  0x1a   : > { %s3880_s15 = scalar_select %p2917_p12, 1, 0 }
  0x1b   : > { %s2925_s17 = scalar_select %p152_p11, %s2763_s20, %s154_s11  }
  0x1c   : > { %p170_p13 = scmp.ne.s32.totalorder %s2759_s19, %s2755_s18  ;;  %p171_p0 = scmp.eq.s32.totalorder %s2024_s30, 3 }
  0x1d   : > { %p2242_p1 = scmp.lt.s32.totalorder %s2795_s28, 4  ;;  %s240_s29 = sand.u32 1, %s2775_s23  }
  0x1e   : > { %p2930_p2 = por %p171_p0, %p170_p13  ;;  %s2027_s10 = sshll.u32 %s240_s29, 7 }
  0x1f   : > { %s2142_s13 = sshll.u32 %s2791_s27, 11  ;;  %s244_s8 = scalar_lea.vmem [#allocation2], %s2027_s10 }
  0x20   : > { %s3881_s21 = scalar_select %p2930_p2, 1, 0 }
  0x21   : > { %s2939_s6 = scalar_lea.hbm %s3866_s2, %s2142_s13  ;;  %s251_s11 = sshll.u32 %s244_s8, 4  ;;  %s2941_s11 = int_to_ptr.vmem [resolvable:$true] %s251_s11 }
  0x22   : > { %p2945_p4 = pnand %p2242_p1, %p2899_p3  ;;  %s2950_s27 = scalar_lea.sflag [#allocation3], %s240_s29 }
  0x23   : > { %s2611_s7 = scalar_lea.hbm %s2939_s6, 2048  ;;  %s2616_s9 = scalar_lea.hbm %s3866_s2, 4096 }
  0x24   : > { %p2612_p6 = scmp.ne.s32.totalorder %s2939_s6, %s2611_s7  ;;  %p2613_p8 = pneg %p2945_p4 }
  0x25   : > { %p2617_p3 = scmp.lt.u32.totalorder %s2939_s6, %s3866_s2  ;;  %p2618_p11 = scmp.lt.u32.totalorder %s2616_s9, %s2611_s7 }
  0x26   : > { %p2614_p9 = pnand %p2613_p8, %p2612_p6  ;;  %p2620_p0 = scmp.lt.u32.totalorder %s2611_s7, %s2939_s6 }
  0x27   : > { %p2619_p13 = por %p2618_p11, %p2617_p3 }
  0x28   : > { %p2615_p10 = pneg %p2614_p9 }
  0x29   : > { %p2621_p1 = por %p2620_p0, %p2619_p13 }
  0x2b   : > { %p2622_p5 = pnand %p2621_p1, %p2615_p10 }
  0x2d   : > { %2625 = shalt.err (!%p2622_p5)
}
  0x2e   : > { %s2626_s29 = scalar_lea.vmem %s2941_s11, 2048  ;;  %s2797_s10 = smov [#allocation2]  }
  0x2f   : > { %p2627_p6 = scmp.ne.s32.totalorder %s2941_s11, %s2626_s29  ;;  %s2631_s13 = sshll.u32 %s2797_s10, 4  ;;  %s2632_s13 = int_to_ptr.vmem [resolvable:$false] %s2631_s13 }
  0x30   : > { %s2633_s14 = scalar_lea.vmem %s2632_s13, 4096  ;;  %p2634_p12 = scmp.lt.s32.totalorder %s2941_s11, %s2632_s13 }
  0x31   : > { %p2629_p9 = pnand %p2627_p6, %p2613_p8  ;;  %p2635_p3 = scmp.lt.s32.totalorder %s2633_s14, %s2626_s29 }
  0x33   : > { %p2630_p2 = pneg %p2629_p9  ;;  %p2636_p11 = por %p2635_p3, %p2634_p12 }
  0x35   : > { %p2637_p13 = pnand %p2636_p11, %p2630_p2 }
  0x37   : > { %2640 = shalt.err (!%p2637_p13)
}
  0x38   : > { %s2798_s7 = smov 64   ;;  %s2799_s9 = smov 4  }
  0x39   : > { %2234 = dma.hbm_to_vmem [thread:$0]  (!%p2945_p4), %s2939_s6, 2048, %s2941_s11, %s2950_s27, %s2798_s7, %s2798_s7, %s2799_s9  }
  0x3a   : > { %p272_p5 = scmp.lt.s32.totalorder %s2795_s28, 5  ;;  %p3883_p8 = scmp.ge.s32.totalorder %s2795_s28, 1 }
  0x3c   : > { %p273_p10 = pnand %p3883_p8, %p272_p5 }
  0x3e   : > { %276 = sbr.rel (%p273_p10) target bundleno = 957 (0x3bd), region = 36 }
  0x45   : > { %s278_s8 = sand.u32 1, %s2771_s22  }
  0x46   : > { %s2031_s29 = sshll.u32 %s278_s8, 7  ;;  %s279_s10 = scalar_lea.sflag [#allocation3], %s278_s8 }
  0x47   : > { %s2982_s13 = scalar_lea.vmem [#allocation2], %s2031_s29 }
  0x48   : > { %2742 = dma.done.wait (%p2909_p7), %s279_s10, 2048  }
  0x49   : > { %2744 = vsyncadd (%p2909_p7), %s279_s10, 4294965248  ;;  %p338_p12 = scmp.lt.s32.totalorder %s2783_s25, 1  ;;  %s2990_s27 = sshll.u32 %s2779_s24, 4  ;;  %v2800_v0 = vmov 0  }
  0x4a   : > { %595 = vmatprep.mubr.bf16.mxu0 %v2800_v0  ;;  %p340_p2 = scmp.lt.s32.totalorder %s2990_s27, 31  ;;  %2338 = vset.pattern.permute.xlu1 %v2800_v0  ;;  %s2134_s30 = sshll.u32 %s2783_s25, 5 }
  0x4b   : > { %s339_s6 = scalar_select %p338_p12, %s2783_s25, 1  ;;  %2337 = vset.pattern.permute.xlu0 %v2800_v0 }
  0x4c   : > { %s341_s7 = scalar_select %p340_p2, %s2990_s27, 31 }
  0x4d   : > { %s2143_s11 = sshll.u32 %s339_s6, 7  ;;  %s2035_s9 = sshll.u32 %s339_s6, 5 }
  0x4e   : > { %s3000_s14 = scalar_lea.vmem %s3865_s1, %s2143_s11  ;;  %s3007_s8 = sadd.s32 %s2035_s9, %s341_s7 }
  0x4f   : > { %v2339_v1 = vld [vmem:[%s3000_s14 + $0x4] ss:$8 sps:$4 sm:$0xff]   ;;  %v2341_v2 = vld [vmem:[%s3000_s14] ss:$8 sps:$4 sm:$0xff]   ;;  %v2342_v3 = vld [vmem:[%s3000_s14 + $0x14] ss:$8 sps:$4 sm:$0xff]  }
  0x50   : > { %563 = vmatprep.subr.bf16.mxu0 %v2339_v1  ;;  %v2344_v4 = vld [vmem:[%s3000_s14 + $0x10] ss:$8 sps:$4 sm:$0xff]   ;;  %v2345_v5 = vld [vmem:[%s3000_s14 + $0x24] ss:$8 sps:$4 sm:$0xff]   ;;  %s2036_s29 = sshll.u32 %s3007_s8, 2  ;;  %s2042_s7 = sshll.u32 %s2779_s24, 7 }
  0x51   : > { %564 = vmatpush1.bf16.msra.mxu0 %v2341_v2  ;;  %v2347_v6 = vld [vmem:[%s3000_s14 + $0x20] ss:$8 sps:$4 sm:$0xff]   ;;  %v2348_v7 = vld [vmem:[%s3000_s14 + $0x34] ss:$8 sps:$4 sm:$0xff]   ;;  %s3016_s11 = scalar_lea.vmem %s3864_s0, %s2036_s29  ;;  %v2350_v8 = vld [vmem:[%s3000_s14 + $0x30] ss:$8 sps:$4 sm:$0xff]  }
  0x52   : > { %565 = vmatprep.subr.bf16.mxu0 %v2342_v3  ;;  %v2351_v9 = vld [vmem:[%s3000_s14 + $0x44] ss:$8 sps:$4 sm:$0xff]   ;;  %v2353_v10 = vld [vmem:[%s3000_s14 + $0x40] ss:$8 sps:$4 sm:$0xff]   ;;  %v2354_v11 = vld [vmem:[%s3000_s14 + $0x54] ss:$8 sps:$4 sm:$0xff]  }
  0x53   : > { %v2356_v12 = vld [vmem:[%s3000_s14 + $0x50] ss:$8 sps:$4 sm:$0xff]   ;;  %v2357_v13 = vld [vmem:[%s3000_s14 + $0x64] ss:$8 sps:$4 sm:$0xff]   ;;  %v2359_v14 = vld [vmem:[%s3000_s14 + $0x60] ss:$8 sps:$4 sm:$0xff]  }
  0x54   : > { %v2360_v15 = vld [vmem:[%s3000_s14 + $0x74] ss:$8 sps:$4 sm:$0xff]   ;;  %v2362_v16 = vld [vmem:[%s3000_s14 + $0x70] ss:$8 sps:$4 sm:$0xff]   ;;  %v2363_v17 = vld [vmem:[%s3016_s11] sm:$0xff]   ;;  %s3675_s9 = sand.u32 1, %s2759_s19  }
  0x55   : > { %566 = vmatpush1.bf16.msra.mxu0 %v2344_v4  ;;  %v2364_v18 = vld [vmem:[%s3016_s11 + $0x8] sm:$0xff]   ;;  %v2365_v19 = vld [vmem:[%s3016_s11 + $0x10] sm:$0xff]   ;;  %v2366_v20 = vld [vmem:[%s3016_s11 + $0x18] sm:$0xff]   ;;  %s2160_s6 = sshll.u32 %s2779_s24, 5  ;;  %p3906_p4 = scmp.ne.s32.totalorder %s3880_s15, 0 }
  0x56   : > { %567 = vmatprep.subr.bf16.mxu0 %v2345_v5  ;;  %v2367_v21 = vld [vmem:[%s3016_s11 + $0x20] sm:$0xff]   ;;  %v2368_v22 = vld [vmem:[%s3016_s11 + $0x28] sm:$0xff]   ;;  %v2369_v23 = vld [vmem:[%s3016_s11 + $0x30] sm:$0xff]  }
  0x57   : > { %v2370_v24 = vld [vmem:[%s3016_s11 + $0x38] sm:$0xff]   ;;  %s2138_s11 = sshll.u32 %s2783_s25, 6  ;;  %s3759_s25 = sadd.s32 %s2134_s30, %s2990_s27 }
  0x58   : > { %s1850_s24 = sadd.s32 %s2160_s6, %s2138_s11  ;;  %s1819_s6 = scalar_lea.sflag [#allocation7], %s3675_s9 }
  0x59   : > { %568 = vmatpush1.bf16.msra.mxu0 %v2347_v6 }
  0x5a   : > { %569 = vmatprep.subr.bf16.mxu0 %v2348_v7 }
  0x5d   : > { %570 = vmatpush1.bf16.msra.mxu0 %v2350_v8 }
  0x5e   : > { %571 = vmatprep.subr.bf16.mxu0 %v2351_v9 }
  0x61   : > { %572 = vmatpush1.bf16.msra.mxu0 %v2353_v10 }
  0x62   : > { %573 = vmatprep.subr.bf16.mxu0 %v2354_v11 }
  0x65   : > { %574 = vmatpush1.bf16.msra.mxu0 %v2356_v12 }
  0x66   : > { %575 = vmatprep.subr.bf16.mxu0 %v2357_v13 }
  0x69   : > { %576 = vmatpush1.bf16.msra.mxu0 %v2359_v14 }
  0x6a   : > { %577 = vmatprep.subr.bf16.mxu0 %v2360_v15 }
  0x6d   : > { %578 = vmatpush1.bf16.msra.mxu0 %v2362_v16 }
  0x70   : > { %596 = vmatmul.mubr.bf16.vlgmr.msra.gmra.mrb[0].mxu0 %v2363_v17  ;;  %v2371_v17 = vld [vmem:[%s2982_s13 + $0x40] sm:$0xff]  }
  0x71   : > { %605 = vmatprep.mubr.bf16.mxu0 %v2800_v0  ;;  %2161 = vmatprep.subr.bf16.mxu1 %v2371_v17 }
  0x78   : > { %606 = vmatmul.mubr.bf16.gmra.mrb[4].mxu0 %v2364_v18  ;;  %v2372_v18 = vld [vmem:[%s2982_s13] sm:$0xff]  }
  0x79   : > { %615 = vmatprep.mubr.bf16.mxu0 %v2800_v0  ;;  %2162 = vmatpush3.bf16.msra.mxu1 %v2372_v18 }
  0x80   : > { %616 = vmatmul.mubr.bf16.gmra.mrb[8].mxu0 %v2365_v19  ;;  %v2373_v19 = vld [vmem:[%s2982_s13 + $0x48] sm:$0xff]  }
  0x81   : > { %625 = vmatprep.mubr.bf16.mxu0 %v2800_v0  ;;  %2163 = vmatprep.subr.bf16.mxu1 %v2373_v19 }
  0x88   : > { %626 = vmatmul.mubr.bf16.gmra.mrb[12].mxu0 %v2366_v20 }
  0x89   : > { %635 = vmatprep.mubr.bf16.mxu0 %v2800_v0 }
  0x90   : > { %636 = vmatmul.mubr.bf16.gmra.mrb[16].mxu0 %v2367_v21 }
  0x91   : > { %645 = vmatprep.mubr.bf16.mxu0 %v2800_v0 }
  0x98   : > { %646 = vmatmul.mubr.bf16.gmra.mrb[20].mxu0 %v2368_v22 }
  0x99   : > { %655 = vmatprep.mubr.bf16.mxu0 %v2800_v0 }
  0xa0   : > { %656 = vmatmul.mubr.bf16.gmra.mrb[24].mxu0 %v2369_v23 }
  0xa1   : > { %665 = vmatprep.mubr.bf16.mxu0 %v2800_v0 }
  0xa8   : > { %666 = vmatmul.mubr.bf16.gmra.mrb[28].mxu0 %v2370_v24 }
 0x143   : > { %v3042_v25 = vpop.f32.mrb[0].mxu0 }
 0x144   : > { %v3044_v26 = vpop.f32.mrb[1].mxu0 }
 0x145   : > { %v3046_v27 = vpop.f32.mrb[2].mxu0  ;;  %v676_v28 = vmax.f32 %v3042_v25, %v3044_v26 }
 0x146   : > { %v3050_v29 = vpop.f32.mrb[3].mxu0 }
 0x147   : > { %677 = vmax.xlane.f32.xlu0 %v676_v28  ;;  %v679_v30 = vmax.f32 %v3046_v27, %v3050_v29 }
 0x14b   : > { %680 = vmax.xlane.f32.xlu0 %v679_v30  ;;  %v3054_v31 = vpop.f32.mrb[4].mxu0 }
 0x14c   : > { %v3056_v32 = vpop.f32.mrb[5].mxu0 }
 0x14d   : > { %v3058_v33 = vpop.f32.mrb[6].mxu0  ;;  %v682_v34 = vmax.f32 %v3054_v31, %v3056_v32 }
 0x14e   : > { %v3062_v35 = vpop.f32.mrb[7].mxu0 }
 0x14f   : > { %683 = vmax.xlane.f32.xlu1 %v682_v34  ;;  %v685_v36 = vmax.f32 %v3058_v33, %v3062_v35 }
 0x153   : > { %686 = vmax.xlane.f32.xlu1 %v685_v36  ;;  %v3066_v37 = vpop.f32.mrb[8].mxu0  ;;  %v2376_v36 = vld [vmem:[%s2982_s13 + $0x10] sm:$0xff]  }
 0x154   : > { %v3068_v38 = vpop.f32.mrb[9].mxu0 }
 0x155   : > { %v3070_v39 = vpop.f32.mrb[10].mxu0  ;;  %v688_v40 = vmax.f32 %v3066_v37, %v3068_v38 }
 0x156   : > { %v3074_v41 = vpop.f32.mrb[11].mxu0 }
 0x157   : > { %689 = vmax.xlane.f32.xlu0 %v688_v40  ;;  %v691_v42 = vmax.f32 %v3070_v39, %v3074_v41 }
 0x159   : > { %692 = vmax.xlane.f32.xlu1 %v691_v42 }
 0x15b   : > { %v3078_v43 = vpop.f32.mrb[12].mxu0 }
 0x15c   : > { %v3080_v44 = vpop.f32.mrb[13].mxu0 }
 0x15d   : > { %v3082_v45 = vpop.f32.mrb[14].mxu0  ;;  %v694_v46 = vmax.f32 %v3078_v43, %v3080_v44 }
 0x15e   : > { %v3086_v47 = vpop.f32.mrb[15].mxu0 }
 0x15f   : > { %695 = vmax.xlane.f32.xlu0 %v694_v46  ;;  %v697_v48 = vmax.f32 %v3082_v45, %v3086_v47 }
 0x161   : > { %698 = vmax.xlane.f32.xlu1 %v697_v48 }
 0x163   : > { %v3090_v49 = vpop.f32.mrb[16].mxu0 }
 0x164   : > { %v3092_v50 = vpop.f32.mrb[17].mxu0 }
 0x165   : > { %v3094_v51 = vpop.f32.mrb[18].mxu0  ;;  %v700_v52 = vmax.f32 %v3090_v49, %v3092_v50 }
 0x166   : > { %v3098_v53 = vpop.f32.mrb[19].mxu0 }
 0x167   : > { %701 = vmax.xlane.f32.xlu0 %v700_v52  ;;  %v703_v54 = vmax.f32 %v3094_v51, %v3098_v53 }
 0x169   : > { %704 = vmax.xlane.f32.xlu1 %v703_v54 }
 0x16b   : > { %v3102_v55 = vpop.f32.mrb[20].mxu0 }
 0x16c   : > { %v3104_v56 = vpop.f32.mrb[21].mxu0 }
 0x16d   : > { %v3106_v57 = vpop.f32.mrb[22].mxu0  ;;  %v706_v58 = vmax.f32 %v3102_v55, %v3104_v56 }
 0x16e   : > { %v3110_v59 = vpop.f32.mrb[23].mxu0 }
 0x16f   : > { %707 = vmax.xlane.f32.xlu0 %v706_v58  ;;  %v709_v60 = vmax.f32 %v3106_v57, %v3110_v59 }
 0x171   : > { %710 = vmax.xlane.f32.xlu1 %v709_v60 }
 0x173   : > { %v3114_v61 = vpop.f32.mrb[24].mxu0 }
 0x174   : > { %v3116_v62 = vpop.f32.mrb[25].mxu0 }
 0x175   : > { %v3118_v63 = vpop.f32.mrb[26].mxu0  ;;  %v712_v0 = vmax.f32 %v3114_v61, %v3116_v62 }
 0x176   : > { %v3122_v1 = vpop.f32.mrb[27].mxu0 }
 0x177   : > { %713 = vmax.xlane.f32.xlu0 %v712_v0  ;;  %v715_v2 = vmax.f32 %v3118_v63, %v3122_v1 }
 0x179   : > { %716 = vmax.xlane.f32.xlu1 %v715_v2 }
 0x17b   : > { %v3126_v3 = vpop.f32.mrb[28].mxu0 }
 0x17c   : > { %v3128_v4 = vpop.f32.mrb[29].mxu0 }
 0x17d   : > { %v3130_v5 = vpop.f32.mrb[30].mxu0  ;;  %v718_v6 = vmax.f32 %v3126_v3, %v3128_v4 }
 0x17e   : > { %v3134_v7 = vpop.f32.mrb[31].mxu0 }
 0x17f   : > { %v721_v8 = vmax.f32 %v3130_v5, %v3134_v7  ;;  %719 = vmax.xlane.f32.xlu0 %v718_v6 }
 0x181   : > { %722 = vmax.xlane.f32.xlu1 %v721_v8 }
 0x1d4   : > { %v678_v9 = vpop.xlane.xlu0 %677 }
 0x1d5   : > { %v724_v10 = vsub.f32 %v3042_v25, %v678_v9  ;;  %v725_v11 = vsub.f32 %v3044_v26, %v678_v9  ;;  %v2374_v25 = vld [vmem:[%s2982_s13 + $0x8] sm:$0xff]   ;;  %v2375_v26 = vld [vmem:[%s2982_s13 + $0x50] sm:$0xff]  }
 0x1d6   : > { %2164 = vmatpush3.bf16.msra.mxu1 %v2374_v25 }
 0x1d7   : > { %v756_v12 = vmul.f32 1.442695, %v724_v10  ;;  %v758_v13 = vmul.f32 1.442695, %v725_v11  ;;  %2165 = vmatprep.subr.bf16.mxu1 %v2375_v26 }
 0x1d8   : > { %v681_v14 = vpop.xlane.xlu0 %680 }
 0x1d9   : > { %2387 = vpow2.f32 %v756_v12  ;;  %v726_v15 = vsub.f32 %v3046_v27, %v681_v14  ;;  %v727_v16 = vsub.f32 %v3050_v29, %v681_v14 }
 0x1da   : > { %2389 = vpow2.f32 %v758_v13  ;;  %2166 = vmatpush3.bf16.msra.mxu1 %v2376_v36 }
 0x1db   : > { %v760_v20 = vmul.f32 1.442695, %v726_v15  ;;  %v762_v21 = vmul.f32 1.442695, %v727_v16 }
 0x1dc   : > { %v684_v22 = vpop.xlane.xlu1 %683 }
 0x1dd   : > { %2391 = vpow2.f32 %v760_v20  ;;  %v728_v23 = vsub.f32 %v3054_v31, %v684_v22  ;;  %v729_v24 = vsub.f32 %v3056_v32, %v684_v22 }
 0x1de   : > { %2393 = vpow2.f32 %v762_v21 }
 0x1df   : > { %v764_v27 = vmul.f32 1.442695, %v728_v23  ;;  %v766_v28 = vmul.f32 1.442695, %v729_v24 }
 0x1e0   : > { %v687_v29 = vpop.xlane.xlu1 %686 }
 0x1e1   : > { %2395 = vpow2.f32 %v764_v27  ;;  %v730_v30 = vsub.f32 %v3058_v33, %v687_v29  ;;  %v731_v34 = vsub.f32 %v3062_v35, %v687_v29  ;;  %v2378_v27 = vld [vmem:[%s2982_s13 + $0x18] sm:$0xff]  }
 0x1e2   : > { %2397 = vpow2.f32 %v766_v28 }
 0x1e3   : > { %v3152_v31 = vpop.eup %2387  ;;  %v768_v32 = vmul.f32 1.442695, %v730_v30  ;;  %v770_v40 = vmul.f32 1.442695, %v731_v34 }
 0x1e4   : > { %v3154_v42 = vpop.eup %2389  ;;  %v690_v46 = vpop.xlane.xlu0 %689 }
 0x1e5   : > { %2399 = vpow2.f32 %v768_v32  ;;  %v732_v48 = vsub.f32 %v3066_v37, %v690_v46  ;;  %v733_v52 = vsub.f32 %v3068_v38, %v690_v46  ;;  %v820_v33 = vadd.f32 %v3154_v42, %v3152_v31 }
 0x1e6   : > { %2401 = vpow2.f32 %v770_v40  ;;  %v693_v35 = vpop.xlane.xlu1 %692 }
 0x1e7   : > { %v3160_v54 = vpop.eup %2391  ;;  %v772_v58 = vmul.f32 1.442695, %v732_v48  ;;  %v774_v60 = vmul.f32 1.442695, %v733_v52  ;;  %v734_v0 = vsub.f32 %v3070_v39, %v693_v35  ;;  %v735_v2 = vsub.f32 %v3074_v41, %v693_v35  ;;  %821 = vadd.xlane.f32.xlu0 %v820_v33  ;;  %v2380_v48 = vld [vmem:[%s2982_s13 + $0x20] sm:$0xff]   ;;  %v2381_v33 = vld [vmem:[%s2982_s13 + $0x68] sm:$0xff]  }
 0x1e8   : > { %v3164_v6 = vpop.eup %2393 }
 0x1e9   : > { %2403 = vpow2.f32 %v772_v58  ;;  %v776_v37 = vmul.f32 1.442695, %v734_v0  ;;  %v778_v38 = vmul.f32 1.442695, %v735_v2  ;;  %v823_v8 = vadd.f32 %v3164_v6, %v3160_v54  ;;  %v2382_v2 = vld [vmem:[%s2982_s13 + $0x28] sm:$0xff]  }
 0x1ea   : > { %2405 = vpow2.f32 %v774_v60 }
 0x1eb   : > { %v3168_v9 = vpop.eup %2395  ;;  %2407 = vpow2.f32 %v776_v37  ;;  %824 = vadd.xlane.f32.xlu1 %v823_v8 }
 0x1ec   : > { %v3170_v10 = vpop.eup %2397  ;;  %2409 = vpow2.f32 %v778_v38  ;;  %v696_v39 = vpop.xlane.xlu0 %695 }
 0x1ed   : > { %v736_v41 = vsub.f32 %v3078_v43, %v696_v39  ;;  %v737_v11 = vsub.f32 %v3080_v44, %v696_v39  ;;  %v826_v12 = vadd.f32 %v3170_v10, %v3168_v9 }
 0x1ee   : > { %v699_v13 = vpop.xlane.xlu1 %698 }
 0x1ef   : > { %v3176_v14 = vpop.eup %2399  ;;  %v780_v15 = vmul.f32 1.442695, %v736_v41  ;;  %v782_v16 = vmul.f32 1.442695, %v737_v11  ;;  %v738_v17 = vsub.f32 %v3082_v45, %v699_v13  ;;  %v739_v18 = vsub.f32 %v3086_v47, %v699_v13  ;;  %827 = vadd.xlane.f32.xlu0 %v826_v12  ;;  %v2377_v47 = vld [vmem:[%s2982_s13 + $0x58] sm:$0xff]  }
 0x1f0   : > { %v3180_v19 = vpop.eup %2401  ;;  %2167 = vmatprep.subr.bf16.mxu1 %v2377_v47 }
 0x1f1   : > { %2411 = vpow2.f32 %v780_v15  ;;  %v784_v43 = vmul.f32 1.442695, %v738_v17  ;;  %v786_v44 = vmul.f32 1.442695, %v739_v18  ;;  %v829_v20 = vadd.f32 %v3180_v19, %v3176_v14  ;;  %2168 = vmatpush3.bf16.msra.mxu1 %v2378_v27  ;;  %v2384_v15 = vld [vmem:[%s2982_s13 + $0x30] sm:$0xff]   ;;  %v2385_v17 = vld [vmem:[%s2982_s13 + $0x78] sm:$0xff]  }
 0x1f2   : > { %2413 = vpow2.f32 %v782_v16 }
 0x1f3   : > { %v3184_v21 = vpop.eup %2403  ;;  %2415 = vpow2.f32 %v784_v43  ;;  %830 = vadd.xlane.f32.xlu1 %v829_v20 }
 0x1f4   : > { %v3186_v22 = vpop.eup %2405  ;;  %2417 = vpow2.f32 %v786_v44  ;;  %v702_v45 = vpop.xlane.xlu0 %701 }
 0x1f5   : > { %v3189_v23 = vpop.eup %2407  ;;  %v740_v24 = vsub.f32 %v3090_v49, %v702_v45  ;;  %v741_v25 = vsub.f32 %v3092_v50, %v702_v45  ;;  %v832_v26 = vadd.f32 %v3186_v22, %v3184_v21  ;;  %v2379_v50 = vld [vmem:[%s2982_s13 + $0x60] sm:$0xff]   ;;  %v2386_v45 = vld [vmem:[%s2982_s13 + $0x38] sm:$0xff]  }
 0x1f6   : > { %v3196_v28 = vpop.eup %2409  ;;  %v705_v29 = vpop.xlane.xlu1 %704  ;;  %2169 = vmatprep.subr.bf16.mxu1 %v2379_v50 }
 0x1f7   : > { %v788_v30 = vmul.f32 1.442695, %v740_v24  ;;  %v790_v34 = vmul.f32 1.442695, %v741_v25  ;;  %v742_v36 = vsub.f32 %v3094_v51, %v705_v29  ;;  %v743_v32 = vsub.f32 %v3098_v53, %v705_v29  ;;  %833 = vadd.xlane.f32.xlu0 %v832_v26  ;;  %2170 = vmatpush3.bf16.msra.mxu1 %v2380_v48 }
 0x1f8   : > { %v835_v49 = vadd.f32 %v3196_v28, %v3189_v23  ;;  %2171 = vmatprep.subr.bf16.mxu1 %v2381_v33 }
 0x1f9   : > { %2419 = vpow2.f32 %v788_v30  ;;  %v792_v40 = vmul.f32 1.442695, %v742_v36  ;;  %v794_v46 = vmul.f32 1.442695, %v743_v32 }
 0x1fa   : > { %2421 = vpow2.f32 %v790_v34  ;;  %836 = vadd.xlane.f32.xlu1 %v835_v49 }
 0x1fb   : > { %v3204_v52 = vpop.eup %2411  ;;  %2423 = vpow2.f32 %v792_v40  ;;  %2172 = vmatpush3.bf16.msra.mxu1 %v2382_v2 }
 0x1fc   : > { %v3206_v51 = vpop.eup %2413  ;;  %2425 = vpow2.f32 %v794_v46  ;;  %v708_v53 = vpop.xlane.xlu0 %707 }
 0x1fd   : > { %v3209_v35 = vpop.eup %2415  ;;  %v744_v58 = vsub.f32 %v3102_v55, %v708_v53  ;;  %v745_v60 = vsub.f32 %v3104_v56, %v708_v53  ;;  %v838_v0 = vadd.f32 %v3206_v51, %v3204_v52  ;;  %v2383_v56 = vld [vmem:[%s2982_s13 + $0x70] sm:$0xff]   ;;  %s2041_s13 = sshll.u32 %s3007_s8, 3  ;;  %s2032_s8 = sshll.u32 %s3675_s9, 7 }
 0x1fe   : > { %v3216_v37 = vpop.eup %2417  ;;  %v711_v38 = vpop.xlane.xlu1 %710  ;;  %2173 = vmatprep.subr.bf16.mxu1 %v2383_v56  ;;  %s3284_s14 = scalar_lea.vmem %s3867_s3, %s2041_s13  ;;  %s3680_s29 = scalar_lea.vmem [#allocation5], %s2032_s8 }
 0x1ff   : > { %v796_v8 = vmul.f32 1.442695, %v744_v58  ;;  %v798_v39 = vmul.f32 1.442695, %v745_v60  ;;  %v746_v41 = vsub.f32 %v3106_v57, %v711_v38  ;;  %v747_v11 = vsub.f32 %v3110_v59, %v711_v38  ;;  %839 = vadd.xlane.f32.xlu0 %v838_v0  ;;  %2174 = vmatpush3.bf16.msra.mxu1 %v2384_v15  ;;  %v1173_v15 = vld [vmem:[%s3284_s14] sm:$0xff]  ;;  %s3692_s10 = scalar_lea.vmem [#allocation6], %s2032_s8 }
 0x200   : > { %v841_v55 = vadd.f32 %v3216_v37, %v3209_v35  ;;  %2175 = vmatprep.subr.bf16.mxu1 %v2385_v17  ;;  %v1182_v17 = vld [vmem:[%s3284_s14 + $0x48] sm:$0xff]  ;;  %s2139_s13 = sshll.u32 %s1850_s24, 6  ;;  %s1853_s12 = sshll.u32 %s3692_s10, 4  ;;  %s3754_s12 = int_to_ptr.vmem [resolvable:$true] %s1853_s12 }
 0x201   : > { %2427 = vpow2.f32 %v796_v8  ;;  %v800_v12 = vmul.f32 1.442695, %v746_v41  ;;  %v802_v13 = vmul.f32 1.442695, %v747_v11  ;;  %s3752_s8 = scalar_lea.hbm %s3869_s5, %s2139_s13  ;;  %s2641_s11 = scalar_lea.vmem %s3754_s12, 2048 }
 0x202   : > { %2429 = vpow2.f32 %v798_v39  ;;  %842 = vadd.xlane.f32.xlu1 %v841_v55  ;;  %p2642_p7 = scmp.ne.s32.totalorder %s3754_s12, %s2641_s11  ;;  %s2801_s24 = smov [#allocation6]  }
 0x203   : > { %v3224_v16 = vpop.eup %2419  ;;  %2431 = vpow2.f32 %v800_v12  ;;  %2176 = vmatpush3.bf16.msra.mxu1 %v2386_v45 }
 0x204   : > { %v3226_v57 = vpop.eup %2421  ;;  %2433 = vpow2.f32 %v802_v13  ;;  %v714_v59 = vpop.xlane.xlu0 %713  ;;  %v1174_v13 = vld [vmem:[%s3284_s14 + $0x8] sm:$0xff]  ;;  %p2643_p0 = pnand %p2642_p7, %p3906_p4 }
 0x205   : > { %v3229_v18 = vpop.eup %2423  ;;  %v748_v43 = vsub.f32 %v3114_v61, %v714_v59  ;;  %v749_v44 = vsub.f32 %v3116_v62, %v714_v59  ;;  %v844_v20 = vadd.f32 %v3226_v57, %v3224_v16  ;;  %v1175_v59 = vld [vmem:[%s3284_s14 + $0x10] sm:$0xff] }
 0x206   : > { %v3236_v47 = vpop.eup %2425  ;;  %v717_v24 = vpop.xlane.xlu1 %716  ;;  %p2644_p1 = pneg %p2643_p0 }
 0x207   : > { %v804_v25 = vmul.f32 1.442695, %v748_v43  ;;  %v806_v26 = vmul.f32 1.442695, %v749_v44  ;;  %v750_v27 = vsub.f32 %v3118_v63, %v717_v24  ;;  %v751_v29 = vsub.f32 %v3122_v1, %v717_v24  ;;  %845 = vadd.xlane.f32.xlu0 %v844_v20  ;;  %v1176_v43 = vld [vmem:[%s3284_s14 + $0x18] sm:$0xff]  ;;  %v1177_v20 = vld [vmem:[%s3284_s14 + $0x20] sm:$0xff] }
 0x208   : > { %v847_v61 = vadd.f32 %v3236_v47, %v3229_v18  ;;  %v1184_v44 = vld [vmem:[%s3284_s14 + $0x58] sm:$0xff]  ;;  %v1186_v24 = vld [vmem:[%s3284_s14 + $0x68] sm:$0xff] }
 0x209   : > { %2435 = vpow2.f32 %v804_v25  ;;  %v808_v62 = vmul.f32 1.442695, %v750_v27  ;;  %v810_v30 = vmul.f32 1.442695, %v751_v29  ;;  %v1188_v29 = vld [vmem:[%s3284_s14 + $0x78] sm:$0xff] }
 0x20a   : > { %2437 = vpow2.f32 %v806_v26  ;;  %848 = vadd.xlane.f32.xlu1 %v847_v61  ;;  %v1178_v26 = vld [vmem:[%s3284_s14 + $0x28] sm:$0xff] }
 0x20b   : > { %v3242_v34 = vpop.eup %2427  ;;  %2439 = vpow2.f32 %v808_v62  ;;  %v1179_v62 = vld [vmem:[%s3284_s14 + $0x30] sm:$0xff] }
 0x20c   : > { %v3244_v36 = vpop.eup %2429  ;;  %2441 = vpow2.f32 %v810_v30  ;;  %v720_v32 = vpop.xlane.xlu0 %719 }
 0x20d   : > { %v3246_v63 = vpop.eup %2431  ;;  %v752_v1 = vsub.f32 %v3126_v3, %v720_v32  ;;  %v753_v49 = vsub.f32 %v3128_v4, %v720_v32  ;;  %v850_v50 = vadd.f32 %v3244_v36, %v3242_v34 }
 0x20e   : > { %v3252_v40 = vpop.eup %2433  ;;  %v723_v46 = vpop.xlane.xlu1 %722 }
 0x20f   : > { %v812_v48 = vmul.f32 1.442695, %v752_v1  ;;  %v814_v53 = vmul.f32 1.442695, %v753_v49  ;;  %851 = vadd.xlane.f32.xlu0 %v850_v50  ;;  %v754_v33 = vsub.f32 %v3130_v5, %v723_v46  ;;  %v755_v58 = vsub.f32 %v3134_v7, %v723_v46  ;;  %v1180_v1 = vld [vmem:[%s3284_s14 + $0x38] sm:$0xff]  ;;  %v1181_v46 = vld [vmem:[%s3284_s14 + $0x40] sm:$0xff] }
 0x210   : > { %v853_v60 = vadd.f32 %v3252_v40, %v3246_v63 }
 0x211   : > { %2443 = vpow2.f32 %v812_v48  ;;  %v816_v3 = vmul.f32 1.442695, %v754_v33  ;;  %v818_v4 = vmul.f32 1.442695, %v755_v58  ;;  %v1183_v33 = vld [vmem:[%s3284_s14 + $0x50] sm:$0xff] }
 0x212   : > { %2445 = vpow2.f32 %v814_v53  ;;  %854 = vadd.xlane.f32.xlu1 %v853_v60  ;;  %v1185_v60 = vld [vmem:[%s3284_s14 + $0x60] sm:$0xff] }
 0x213   : > { %v3258_v0 = vpop.eup %2435  ;;  %2447 = vpow2.f32 %v816_v3 }
 0x214   : > { %v3260_v2 = vpop.eup %2437  ;;  %2449 = vpow2.f32 %v818_v4  ;;  %v1187_v4 = vld [vmem:[%s3284_s14 + $0x70] sm:$0xff]  ;;  %s2645_s14 = sshll.u32 %s2801_s24, 4  ;;  %s2646_s14 = int_to_ptr.vmem [resolvable:$false] %s2645_s14 }
 0x215   : > { %v3262_v38 = vpop.eup %2439  ;;  %v856_v5 = vadd.f32 %v3260_v2, %v3258_v0  ;;  %2451 = vrcp.f32 %v1174_v13  ;;  %v366_v13 = vlaneseq  ;;  %s2647_s13 = scalar_lea.vmem %s2646_s14, 4096  ;;  %p2648_p6 = scmp.lt.s32.totalorder %s3754_s12, %s2646_s14 }
 0x216   : > { %v3266_v7 = vpop.eup %2441  ;;  %2453 = vrcp.f32 %v1173_v15  ;;  %p2649_p9 = scmp.lt.s32.totalorder %s2647_s13, %s2641_s11 }
 0x217   : > { %857 = vadd.xlane.f32.xlu0 %v856_v5  ;;  %v859_v8 = vadd.f32 %v3266_v7, %v3262_v38  ;;  %2455 = vrcp.f32 %v1175_v59  ;;  %v3304_v15 = vshrl.u32 %v366_v13, 7 }
 0x218   : > { %2457 = vrcp.f32 %v1182_v17  ;;  %p2650_p3 = por %p2649_p9, %p2648_p6 }
 0x219   : > { %860 = vadd.xlane.f32.xlu1 %v859_v8  ;;  %2459 = vrcp.f32 %v1176_v43  ;;  %v368_v17 = vadd.s32 8, %v3304_v15  ;;  %v3308_v43 = vand.u32 127, %v366_v13 }
 0x21a   : > { %2461 = vrcp.f32 %v1184_v44  ;;  %p2651_p11 = pnand %p2650_p3, %p2644_p1 }
 0x21b   : > { %v3270_v39 = vpop.eup %2443  ;;  %2463 = vrcp.f32 %v1177_v20  ;;  %v3310_v20 = vstv %s2042_s7 }
 0x21c   : > { %v3272_v41 = vpop.eup %2445  ;;  %2465 = vrcp.f32 %v1186_v24  ;;  %v3314_v24 = vadd.s32 128, %v3308_v43 }
 0x21d   : > { %v3275_v11 = vpop.eup %2447  ;;  %v862_v55 = vadd.f32 %v3272_v41, %v3270_v39  ;;  %2467 = vrcp.f32 %v1178_v26  ;;  %v384_v26 = vadd.s32 %v3310_v20, %v3304_v15 }
 0x21e   : > { %v3279_v56 = vpop.eup %2449  ;;  %2469 = vrcp.f32 %v1188_v29 }
 0x21f   : > { %863 = vadd.xlane.f32.xlu0 %v862_v55  ;;  %v865_v12 = vadd.f32 %v3279_v56, %v3275_v11  ;;  %v2452_v45 = vpop.eup %2451  ;;  %2471 = vrcp.f32 %v1179_v62 }
 0x220   : > { %v2454_v25 = vpop.eup %2453  ;;  %2473 = vrcp.f32 %v1180_v1  ;;  %v1206_v1 = vsub.s32 %v384_v26, %v3314_v24 }
 0x221   : > { %866 = vadd.xlane.f32.xlu1 %v865_v12  ;;  %v2456_v27 = vpop.eup %2455  ;;  %2475 = vrcp.f32 %v1181_v46 }
 0x222   : > { %v2458_v61 = vpop.eup %2457  ;;  %2477 = vrcp.f32 %v1183_v33  ;;  %v371_v33 = vadd.s32 32, %v3304_v15 }
 0x223   : > { %v2460_v30 = vpop.eup %2459  ;;  %2479 = vrcp.f32 %v1185_v60 }
 0x224   : > { %v2462_v32 = vpop.eup %2461  ;;  %2481 = vrcp.f32 %v1187_v4 }
 0x225   : > { %v2464_v49 = vpop.eup %2463 }
 0x226   : > { %v2466_v50 = vpop.eup %2465 }
 0x227   : > { %v2468_v48 = vpop.eup %2467 }
 0x228   : > { %v2470_v53 = vpop.eup %2469 }
 0x229   : > { %v2472_v58 = vpop.eup %2471 }
 0x22a   : > { %v2474_v3 = vpop.eup %2473 }
 0x22b   : > { %v2476_v5 = vpop.eup %2475 }
 0x22c   : > { %v2478_v8 = vpop.eup %2477 }
 0x22d   : > { %v2480_v55 = vpop.eup %2479 }
 0x22e   : > { %v2482_v12 = vpop.eup %2481 }
 0x232   : > { %1372 = vperm.xlu1 %2338, %v2452_v45   ;;  %v385_v45 = vadd.s32 %v3310_v20, %v368_v17 }
 0x234   : > { %v1207_v29 = vsub.s32 %v385_v45, %v3308_v43 }
 0x235   : > { %1367 = vperm.xlu0 %2337, %v2454_v25  }
 0x236   : > { %1377 = vperm.xlu1 %2338, %v2456_v27   ;;  %v369_v27 = vadd.s32 16, %v3304_v15 }
 0x239   : > { %1412 = vperm.xlu0 %2337, %v2458_v61   ;;  %v1208_v61 = vsub.s32 %v385_v45, %v3314_v24 }
 0x23a   : > { %1382 = vperm.xlu1 %2338, %v2460_v30   ;;  %v1205_v30 = vsub.s32 %v384_v26, %v3308_v43 }
 0x23d   : > { %1422 = vperm.xlu0 %2337, %v2462_v32  }
 0x23e   : > { %1387 = vperm.xlu1 %2338, %v2464_v49   ;;  %v386_v49 = vadd.s32 %v3310_v20, %v369_v27 }
 0x241   : > { %1432 = vperm.xlu0 %2337, %v2466_v50   ;;  %v370_v50 = vadd.s32 24, %v3304_v15 }
 0x242   : > { %1392 = vperm.xlu1 %2338, %v2468_v48   ;;  %v1244_v48 = vsub.s32 0, %v1207_v29 }
 0x243   : > { %v387_v13 = vadd.s32 %v3310_v20, %v370_v50 }
 0x245   : > { %1442 = vperm.xlu0 %2337, %v2470_v53   ;;  %v1247_v53 = vsub.s32 0, %v1208_v61  ;;  %v1211_v26 = vsub.s32 %v387_v13, %v3308_v43  ;;  %v1212_v27 = vsub.s32 %v387_v13, %v3314_v24 }
 0x246   : > { %1397 = vperm.xlu1 %2338, %v2472_v58  }
 0x24a   : > { %1402 = vperm.xlu1 %2338, %v2474_v3  }
 0x24e   : > { %1407 = vperm.xlu1 %2338, %v2476_v5  }
 0x252   : > { %1417 = vperm.xlu1 %2338, %v2478_v8   ;;  %v1238_v8 = vsub.s32 0, %v1205_v30 }
 0x256   : > { %1427 = vperm.xlu1 %2338, %v2480_v55   ;;  %v1241_v55 = vsub.s32 0, %v1206_v1 }
 0x258   : > { %v3343_v50 = vmin.u32 %v1241_v55, %v1206_v1 }
 0x25a   : > { %1437 = vperm.xlu1 %2338, %v2482_v12   ;;  %v1209_v12 = vsub.s32 %v386_v49, %v3308_v43 }
 0x274   : > { %v822_v59 = vpop.xlane.xlu0 %821 }
 0x275   : > { %2483 = vrcp.f32 %v822_v59 }
 0x278   : > { %v825_v44 = vpop.xlane.xlu1 %824 }
 0x279   : > { %2485 = vrcp.f32 %v825_v44  ;;  %v372_v44 = vadd.s32 40, %v3304_v15 }
 0x27c   : > { %v828_v25 = vpop.xlane.xlu0 %827 }
 0x27d   : > { %2487 = vrcp.f32 %v828_v25  ;;  %v1250_v25 = vsub.s32 0, %v1209_v12 }
 0x27f   : > { %v2484_v32 = vpop.eup %2483 }
 0x280   : > { %v831_v62 = vpop.xlane.xlu1 %830  ;;  %v885_v60 = vmul.f32 %v2484_v32, %v3154_v42  ;;  %v884_v4 = vmul.f32 %v2484_v32, %v3152_v31  ;;  %v1210_v42 = vsub.s32 %v386_v49, %v3314_v24  ;;  %v3341_v32 = vmin.u32 %v1238_v8, %v1205_v30 }
 0x281   : > { %2489 = vrcp.f32 %v831_v62  ;;  %v3339_v62 = vmin.u32 %v1247_v53, %v1208_v61  ;;  %v389_v49 = vadd.s32 %v3310_v20, %v372_v44  ;;  %v3353_v53 = vmin.u32 %v1250_v25, %v1209_v12 }
 0x282   : > { %v376_v8 = vadd.s32 72, %v3304_v15 }
 0x283   : > { %v2486_v46 = vpop.eup %2485 }
 0x284   : > { %v834_v58 = vpop.xlane.xlu0 %833  ;;  %v887_v3 = vmul.f32 %v2486_v46, %v3164_v6  ;;  %v886_v5 = vmul.f32 %v2486_v46, %v3160_v54  ;;  %v388_v6 = vadd.s32 %v3310_v20, %v371_v33  ;;  %v3335_v54 = vmin.u32 %v1244_v48, %v1207_v29 }
 0x285   : > { %2491 = vrcp.f32 %v834_v58  ;;  %v1253_v33 = vsub.s32 0, %v1210_v42  ;;  %v373_v48 = vadd.s32 48, %v3304_v15  ;;  %v393_v25 = vadd.s32 %v3310_v20, %v376_v8 }
 0x286   : > { %v917_v59 = vpack.c.bf16 %v887_v3, %v885_v60  ;;  %v916_v17 = vpack.c.bf16 %v886_v5, %v884_v4  ;;  %v1213_v58 = vsub.s32 %v388_v6, %v3308_v43  ;;  %v1214_v29 = vsub.s32 %v388_v6, %v3314_v24 }
 0x287   : > { %v837_v45 = vpop.xlane.xlu1 %836  ;;  %v2488_v31 = vpop.eup %2487  ;;  %v1256_v4 = vsub.s32 0, %v1211_v26  ;;  %v1259_v5 = vsub.s32 0, %v1212_v27 }
 0x288   : > { %2493 = vrcp.f32 %v837_v45  ;;  %1092 = vmatprep.mubr.bf16.mxu1 %v917_v59  ;;  %v889_v3 = vmul.f32 %v2488_v31, %v3170_v10  ;;  %v888_v30 = vmul.f32 %v2488_v31, %v3168_v9  ;;  %v1215_v59 = vsub.s32 %v389_v49, %v3308_v43 }
 0x289   : > { %1093 = vmatmul.mubr.bf16.vlgmr.msra.gmra.mrb[0].mxu1 %v916_v17  ;;  %v390_v9 = vadd.s32 %v3310_v20, %v373_v48  ;;  %v1262_v12 = vsub.s32 0, %v1213_v58  ;;  %v1265_v45 = vsub.s32 0, %v1214_v29  ;;  %v3362_v31 = vmin.u32 %v1253_v33, %v1210_v42 }
 0x28a   : > { %v3367_v48 = vmin.u32 %v1256_v4, %v1211_v26 }
 0x28b   : > { %v2490_v46 = vpop.eup %2489  ;;  %v1217_v42 = vsub.s32 %v390_v9, %v3308_v43  ;;  %v3375_v8 = vmin.u32 %v1262_v12, %v1213_v58  ;;  %v1218_v26 = vsub.s32 %v390_v9, %v3314_v24  ;;  %v380_v58 = vadd.s32 104, %v3304_v15 }
 0x28c   : > { %v840_v60 = vpop.xlane.xlu0 %839  ;;  %v891_v61 = vmul.f32 %v2490_v46, %v3180_v19  ;;  %v890_v1 = vmul.f32 %v2490_v46, %v3176_v14  ;;  %v1216_v46 = vsub.s32 %v389_v49, %v3314_v24  ;;  %v3377_v49 = vmin.u32 %v1265_v45, %v1214_v29 }
 0x28d   : > { %2495 = vrcp.f32 %v840_v60  ;;  %v397_v9 = vadd.s32 %v3310_v20, %v380_v58  ;;  %v382_v45 = vadd.s32 120, %v3304_v15 }
 0x28e   : > { %v919_v55 = vpack.c.bf16 %v891_v61, %v889_v3  ;;  %v918_v13 = vpack.c.bf16 %v890_v1, %v888_v30  ;;  %v3369_v61 = vmin.u32 %v1259_v5, %v1212_v27  ;;  %v1268_v30 = vsub.s32 0, %v1215_v59 }
 0x28f   : > { %v843_v17 = vpop.xlane.xlu1 %842  ;;  %v2492_v44 = vpop.eup %2491  ;;  %v1271_v5 = vsub.s32 0, %v1216_v46 }
 0x290   : > { %2497 = vrcp.f32 %v843_v17  ;;  %1100 = vmatprep.mubr.bf16.mxu1 %v919_v55  ;;  %v893_v1 = vmul.f32 %v2492_v44, %v3186_v22  ;;  %v378_v17 = vadd.s32 88, %v3304_v15  ;;  %v892_v4 = vmul.f32 %v2492_v44, %v3184_v21 }
 0x291   : > { %1101 = vmatmul.mubr.bf16.gmra.mrb[4].mxu1 %v918_v13  ;;  %v1223_v22 = vsub.s32 %v393_v25, %v3308_v43 }
 0x292   : > { %v2494_v60 = vpop.eup %2493  ;;  %v395_v44 = vadd.s32 %v3310_v20, %v378_v17 }
 0x293   : > { %v895_v55 = vmul.f32 %v2494_v60, %v3196_v28  ;;  %v894_v13 = vmul.f32 %v2494_v60, %v3189_v23  ;;  %v1224_v23 = vsub.s32 %v393_v25, %v3314_v24  ;;  %v3384_v28 = vmin.u32 %v1268_v30, %v1215_v59 }
 0x294   : > { %v846_v33 = vpop.xlane.xlu0 %845  ;;  %v1274_v60 = vsub.s32 0, %v1217_v42  ;;  %v1292_v30 = vsub.s32 0, %v1223_v22 }
 0x295   : > { %v921_v27 = vpack.c.bf16 %v895_v55, %v893_v1  ;;  %2499 = vrcp.f32 %v846_v33  ;;  %v920_v12 = vpack.c.bf16 %v894_v13, %v892_v4  ;;  %v1277_v55 = vsub.s32 0, %v1218_v26 }
 0x296   : > { %v3393_v33 = vmin.u32 %v1271_v5, %v1216_v46  ;;  %v3401_v59 = vmin.u32 %v1274_v60, %v1217_v42  ;;  %v1227_v46 = vsub.s32 %v395_v44, %v3308_v43  ;;  %v375_v4 = vadd.s32 64, %v3304_v15 }
 0x297   : > { %1108 = vmatprep.mubr.bf16.mxu1 %v921_v27  ;;  %v849_v29 = vpop.xlane.xlu1 %848  ;;  %v2496_v1 = vpop.eup %2495  ;;  %v1295_v27 = vsub.s32 0, %v1224_v23  ;;  %v3404_v5 = vmin.u32 %v1277_v55, %v1218_v26  ;;  %v3409_v6 = vmin.u32 %v1292_v30, %v1223_v22 }
 0x298   : > { %2501 = vrcp.f32 %v849_v29  ;;  %v374_v29 = vadd.s32 56, %v3304_v15  ;;  %v897_v21 = vmul.f32 %v2496_v1, %v3206_v51  ;;  %v896_v3 = vmul.f32 %v2496_v1, %v3204_v52 }
 0x299   : > { %1109 = vmatmul.mubr.bf16.gmra.mrb[8].mxu1 %v920_v12  ;;  %3884 = vst [vmem:[#allocation14_spill] sm:$0xff] %v3404_v5  ;;  %v1228_v51 = vsub.s32 %v395_v44, %v3314_v24  ;;  %v3415_v55 = vmin.u32 %v1295_v27, %v1224_v23  ;;  %v377_v52 = vadd.s32 80, %v3304_v15  ;;  %v1304_v1 = vsub.s32 0, %v1227_v46 }
 0x29a   : > { %v2498_v13 = vpop.eup %2497  ;;  %v391_v42 = vadd.s32 %v3310_v20, %v374_v29  ;;  %v399_v44 = vadd.s32 %v3310_v20, %v382_v45 }
 0x29b   : > { %v899_v17 = vmul.f32 %v2498_v13, %v3216_v37  ;;  %v898_v12 = vmul.f32 %v2498_v13, %v3209_v35  ;;  %v1231_v35 = vsub.s32 %v397_v9, %v3308_v43  ;;  %v1232_v37 = vsub.s32 %v397_v9, %v3314_v24 }
 0x29c   : > { %v852_v25 = vpop.xlane.xlu0 %851  ;;  %v1307_v30 = vsub.s32 0, %v1228_v51  ;;  %v1236_v13 = vsub.s32 %v399_v44, %v3314_v24 }
 0x29d   : > { %v923_v58 = vpack.c.bf16 %v899_v17, %v897_v21  ;;  %2503 = vrcp.f32 %v852_v25  ;;  %v922_v60 = vpack.c.bf16 %v898_v12, %v896_v3  ;;  %v392_v25 = vadd.s32 %v3310_v20, %v375_v4 }
 0x29e   : > { %v1316_v27 = vsub.s32 0, %v1231_v35  ;;  %v1319_v29 = vsub.s32 0, %v1232_v37  ;;  %v1219_v17 = vsub.s32 %v391_v42, %v3308_v43  ;;  %v1220_v12 = vsub.s32 %v391_v42, %v3314_v24 }
 0x29f   : > { %1116 = vmatprep.mubr.bf16.mxu1 %v923_v58  ;;  %v855_v26 = vpop.xlane.xlu1 %854  ;;  %v2500_v22 = vpop.eup %2499  ;;  %v3430_v21 = vmin.u32 %v1304_v1, %v1227_v46  ;;  %v1235_v3 = vsub.s32 %v399_v44, %v3308_v43  ;;  %v1221_v9 = vsub.s32 %v392_v25, %v3308_v43  ;;  %v1222_v46 = vsub.s32 %v392_v25, %v3314_v24 }
 0x2a0   : > { %2505 = vrcp.f32 %v855_v26  ;;  %v901_v58 = vmul.f32 %v2500_v22, %v3226_v57  ;;  %v394_v26 = vadd.s32 %v3310_v20, %v377_v52  ;;  %v900_v42 = vmul.f32 %v2500_v22, %v3224_v16 }
 0x2a1   : > { %1117 = vmatmul.mubr.bf16.gmra.mrb[12].mxu1 %v922_v60  ;;  %v379_v57 = vadd.s32 96, %v3304_v15  ;;  %v1283_v52 = vsub.s32 0, %v1220_v12  ;;  %v3439_v19 = vmin.u32 %v1307_v30, %v1228_v51  ;;  %v1286_v16 = vsub.s32 0, %v1221_v9 }
 0x2a2   : > { %v2502_v23 = vpop.eup %2501  ;;  %v1225_v44 = vsub.s32 %v394_v26, %v3308_v43  ;;  %v1226_v22 = vsub.s32 %v394_v26, %v3314_v24  ;;  %v3444_v10 = vmin.u32 %v1316_v27, %v1231_v35  ;;  %v3446_v5 = vmin.u32 %v1319_v29, %v1232_v37 }
 0x2a3   : > { %v903_v45 = vmul.f32 %v2502_v23, %v3236_v47  ;;  %v902_v4 = vmul.f32 %v2502_v23, %v3229_v18  ;;  %v1280_v23 = vsub.s32 0, %v1219_v17  ;;  %v1355_v18 = vcvt.s32.f32 %v3430_v21 }
 0x2a4   : > { %v858_v60 = vpop.xlane.xlu0 %857  ;;  %v3451_v30 = vmin.u32 %v1283_v52, %v1220_v12  ;;  %v1298_v35 = vsub.s32 0, %v1225_v44  ;;  %v1360_v52 = vcvt.s32.f32 %v3446_v5 }
 0x2a5   : > { %2507 = vrcp.f32 %v858_v60  ;;  %v925_v14 = vpack.c.bf16 %v903_v45, %v901_v58  ;;  %v924_v1 = vpack.c.bf16 %v902_v4, %v900_v42  ;;  %v1328_v58 = vsub.s32 0, %v1235_v3 }
 0x2a6   : > { %v861_v47 = vpop.xlane.xlu1 %860  ;;  %v1331_v45 = vsub.s32 0, %v1236_v13  ;;  %v3449_v51 = vmin.u32 %v1280_v23, %v1219_v17  ;;  %v1289_v4 = vsub.s32 0, %v1222_v46  ;;  %v381_v42 = vadd.s32 112, %v3304_v15 }
 0x2a7   : > { %1124 = vmatprep.mubr.bf16.mxu1 %v925_v14  ;;  %2509 = vrcp.f32 %v861_v47  ;;  %v2504_v60 = vpop.eup %2503  ;;  %v396_v14 = vadd.s32 %v3310_v20, %v379_v57  ;;  %v3457_v37 = vmin.u32 %v1328_v58, %v1235_v3  ;;  %v3461_v57 = vmin.u32 %v1286_v16, %v1221_v9 }
 0x2a8   : > { %v905_v47 = vmul.f32 %v2504_v60, %v3244_v36  ;;  %v3459_v29 = vmin.u32 %v1331_v45, %v1236_v13  ;;  %v1301_v17 = vsub.s32 0, %v1226_v22  ;;  %v904_v23 = vmul.f32 %v2504_v60, %v3242_v34 }
 0x2a9   : > { %1125 = vmatmul.mubr.bf16.gmra.mrb[16].mxu1 %v924_v1  ;;  %v1229_v15 = vsub.s32 %v396_v14, %v3308_v43  ;;  %v398_v3 = vadd.s32 %v3310_v20, %v381_v42  ;;  %v3469_v58 = vmin.u32 %v1289_v4, %v1222_v46  ;;  %v3471_v45 = vmin.u32 %v1298_v35, %v1225_v44 }
 0x2aa   : > { %v2506_v25 = vpop.eup %2505  ;;  %v1347_v34 = vcvt.s32.f32 %v3449_v51  ;;  %v1348_v60 = vcvt.s32.f32 %v3451_v30  ;;  %v3475_v16 = vmin.u32 %v1301_v17, %v1226_v22  ;;  %v1349_v46 = vcvt.s32.f32 %v3461_v57 }
 0x2ab   : > { %v907_v26 = vmul.f32 %v2506_v25, %v3252_v40  ;;  %v906_v1 = vmul.f32 %v2506_v25, %v3246_v63  ;;  %v1356_v40 = vcvt.s32.f32 %v3439_v19  ;;  %v1359_v63 = vcvt.s32.f32 %v3444_v10 }
 0x2ac   : > { %v864_v27 = vpop.xlane.xlu0 %863  ;;  %v3478_v25 = vsub.s32 %v396_v14, %v3314_v24  ;;  %v1310_v4 = vsub.s32 0, %v1229_v15  ;;  %v3487_v35 = vsub.s32 %v398_v3, %v3308_v43  ;;  %v3885_v14 = vcvt.s32.f32 %v3335_v54 }
 0x2ad   : > { %2511 = vrcp.f32 %v864_v27  ;;  %v927_v12 = vpack.c.bf16 %v907_v26, %v905_v47  ;;  %v926_v9 = vpack.c.bf16 %v906_v1, %v904_v23  ;;  %v3886_v17 = vcvt.s32.f32 %v3339_v62 }
 0x2ae   : > { %v867_v36 = vpop.xlane.xlu1 %866  ;;  %v1350_v23 = vcvt.s32.f32 %v3469_v58  ;;  %v3887_v54 = vcvt.s32.f32 %v3341_v32  ;;  %v3888_v62 = vcvt.s32.f32 %v3343_v50  ;;  %v3889_v32 = vcvt.s32.f32 %v3353_v53 }
 0x2af   : > { %v2508_v13 = vpop.eup %2507  ;;  %1132 = vmatprep.mubr.bf16.mxu1 %v927_v12  ;;  %2513 = vrcp.f32 %v867_v36  ;;  %v3502_v36 = vmin.u32 %v1310_v4, %v1229_v15  ;;  %v3890_v50 = vcvt.s32.f32 %v3362_v31  ;;  %v3904_v58 = vcvt.s32.f32 %v3475_v16 }
 0x2b0   : > { %v909_v26 = vmul.f32 %v2508_v13, %v3260_v2  ;;  %v908_v2 = vmul.f32 %v2508_v13, %v3258_v0  ;;  %v1322_v0 = vsub.s32 0, %v3487_v35 }
 0x2b1   : > { %v2510_v47 = vpop.eup %2509  ;;  %1133 = vmatmul.mubr.bf16.gmra.mrb[20].mxu1 %v926_v9 }
 0x2b2   : > { %v1373_v44 = vpop.permute.xlu1 %1372  ;;  %v911_v1 = vmul.f32 %v2510_v47, %v3266_v7  ;;  %v910_v22 = vmul.f32 %v2510_v47, %v3262_v38  ;;  %v1313_v38 = vsub.s32 0, %v3478_v25 }
 0x2b3   : > { %v1447_v27 = vmul.f32 %v1373_v44, %v3885_v14  ;;  %v1448_v12 = vmul.f32 %v1373_v44, %v3886_v17 }
 0x2b4   : > { %v1368_v9 = vpop.permute.xlu0 %1367  ;;  %v929_v42 = vpack.c.bf16 %v911_v1, %v909_v26  ;;  %v928_v20 = vpack.c.bf16 %v910_v22, %v908_v2  ;;  %v3505_v26 = vsub.s32 %v398_v3, %v3314_v24 }
 0x2b5   : > { %v1479_v43 = vmul.f32 %v1447_v27, %v1447_v27  ;;  %v1480_v47 = vmul.f32 %v1448_v12, %v1448_v12  ;;  %v1445_v14 = vmul.f32 %v1368_v9, %v3887_v54  ;;  %v1446_v44 = vmul.f32 %v1368_v9, %v3888_v62 }
 0x2b6   : > { %1140 = vmatprep.mubr.bf16.mxu1 %v929_v42  ;;  %v1378_v17 = vpop.permute.xlu1 %1377 }
 0x2b7   : > { %v2512_v13 = vpop.eup %2511  ;;  %v1511_v1 = vmul.f32 -0.5, %v1479_v43  ;;  %v1512_v27 = vmul.f32 -0.5, %v1480_v47  ;;  %v1477_v12 = vmul.f32 %v1445_v14, %v1445_v14  ;;  %v1478_v7 = vmul.f32 %v1446_v44, %v1446_v44 }
 0x2b8   : > { %v1449_v54 = vmul.f32 %v1378_v17, %v3889_v32  ;;  %v1450_v42 = vmul.f32 %v1378_v17, %v3890_v50  ;;  %v913_v22 = vmul.f32 %v2512_v13, %v3272_v41  ;;  %v912_v15 = vmul.f32 %v2512_v13, %v3270_v39  ;;  %v1413_v43 = vpop.permute.xlu0 %1412 }
 0x2b9   : > { %v2514_v4 = vpop.eup %2513  ;;  %v1545_v24 = vmul.f32 1.442695, %v1511_v1  ;;  %v1547_v3 = vmul.f32 1.442695, %v1512_v27  ;;  %v1509_v9 = vmul.f32 -0.5, %v1477_v12  ;;  %v1510_v2 = vmul.f32 -0.5, %v1478_v7  ;;  %1141 = vmatmul.mubr.bf16.gmra.mrb[24].mxu1 %v928_v20 }
 0x2ba   : > { %v1481_v47 = vmul.f32 %v1449_v54, %v1449_v54  ;;  %v1482_v14 = vmul.f32 %v1450_v42, %v1450_v42  ;;  %v1383_v62 = vpop.permute.xlu1 %1382  ;;  %v915_v53 = vmul.f32 %v2514_v4, %v3279_v56  ;;  %v3891_v44 = vcvt.s32.f32 %v3409_v6 }
 0x2bb   : > { %2515 = vpow2.f32 %v1545_v24  ;;  %v1541_v17 = vmul.f32 1.442695, %v1509_v9  ;;  %v1543_v41 = vmul.f32 1.442695, %v1510_v2  ;;  %v3892_v39 = vcvt.s32.f32 %v3367_v48 }
 0x2bc   : > { %v1463_v31 = vmul.f32 %v1413_v43, %v3891_v44  ;;  %2517 = vpow2.f32 %v1547_v3  ;;  %v1513_v1 = vmul.f32 -0.5, %v1481_v47  ;;  %v1514_v27 = vmul.f32 -0.5, %v1482_v14 }
 0x2bd   : > { %v1451_v13 = vmul.f32 %v1383_v62, %v3892_v39  ;;  %v3893_v20 = vcvt.s32.f32 %v3369_v61  ;;  %2519 = vpow2.f32 %v1541_v17  ;;  %v931_v32 = vpack.c.bf16 %v915_v53, %v913_v22 }
 0x2be   : > { %v3894_v56 = vcvt.s32.f32 %v3415_v55  ;;  %2521 = vpow2.f32 %v1543_v41  ;;  %v1549_v6 = vmul.f32 1.442695, %v1513_v1  ;;  %v1551_v50 = vmul.f32 1.442695, %v1514_v27  ;;  %v1388_v24 = vpop.permute.xlu1 %1387 }
 0x2bf   : > { %v1452_v7 = vmul.f32 %v1383_v62, %v3893_v20  ;;  %v1483_v12 = vmul.f32 %v1451_v13, %v1451_v13  ;;  %1148 = vmatprep.mubr.bf16.mxu1 %v931_v32  ;;  %v3895_v48 = vcvt.s32.f32 %v3375_v8  ;;  %v3896_v2 = vcvt.s32.f32 %v3377_v49 }
 0x2c0   : > { %v1464_v54 = vmul.f32 %v1413_v43, %v3894_v56  ;;  %v1495_v47 = vmul.f32 %v1463_v31, %v1463_v31  ;;  %2523 = vpow2.f32 %v1549_v6  ;;  %v914_v55 = vmul.f32 %v2514_v4, %v3275_v11  ;;  %v1423_v43 = vpop.permute.xlu0 %1422 }
 0x2c1   : > { %v1484_v42 = vmul.f32 %v1452_v7, %v1452_v7  ;;  %v1515_v9 = vmul.f32 -0.5, %v1483_v12  ;;  %v1453_v3 = vmul.f32 %v1388_v24, %v3895_v48  ;;  %v1454_v61 = vmul.f32 %v1388_v24, %v3896_v2 }
 0x2c2   : > { %v1496_v22 = vmul.f32 %v1464_v54, %v1464_v54  ;;  %2525 = vpow2.f32 %v1551_v50  ;;  %v1527_v41 = vmul.f32 -0.5, %v1495_v47  ;;  %v930_v13 = vpack.c.bf16 %v914_v55, %v912_v15  ;;  %v1393_v8 = vpop.permute.xlu1 %1392 }
 0x2c3   : > { %v1516_v14 = vmul.f32 -0.5, %v1484_v42  ;;  %v1553_v62 = vmul.f32 1.442695, %v1515_v9  ;;  %v1485_v53 = vmul.f32 %v1453_v3, %v1453_v3  ;;  %v1486_v44 = vmul.f32 %v1454_v61, %v1454_v61 }
 0x2c4   : > { %v1528_v39 = vmul.f32 -0.5, %v1496_v22  ;;  %v3897_v31 = vcvt.s32.f32 %v3384_v28  ;;  %v1577_v20 = vmul.f32 1.442695, %v1527_v41  ;;  %1149 = vmatmul.mubr.bf16.gmra.mrb[28].mxu1 %v930_v13  ;;  %v3898_v11 = vcvt.s32.f32 %v3393_v33  ;;  %v1433_v24 = vpop.permute.xlu0 %1432  ;;  %v3900_v22 = vld [vmem:[#allocation14_spill] sm:$0xff] }
 0x2c5   : > { %v1555_v17 = vmul.f32 1.442695, %v1516_v14  ;;  %2527 = vpow2.f32 %v1553_v62  ;;  %v1517_v1 = vmul.f32 -0.5, %v1485_v53  ;;  %v1518_v49 = vmul.f32 -0.5, %v1486_v44  ;;  %v3533_v12 = vpop.eup %2515 }
 0x2c6   : > { %v1455_v27 = vmul.f32 %v1393_v8, %v3897_v31  ;;  %v1456_v4 = vmul.f32 %v1393_v8, %v3898_v11  ;;  %v1325_v7 = vsub.s32 0, %v3505_v26  ;;  %v1467_v54 = vmul.f32 %v1423_v43, %v1355_v18  ;;  %v3537_v6 = vpop.eup %2517  ;;  %v1398_v33 = vpop.permute.xlu1 %1397 }
 0x2c7   : > { %2529 = vpow2.f32 %v1555_v17  ;;  %v1557_v32 = vmul.f32 1.442695, %v1517_v1  ;;  %v1559_v56 = vmul.f32 1.442695, %v1518_v49  ;;  %v1579_v28 = vmul.f32 1.442695, %v1528_v39  ;;  %v3541_v9 = vpop.eup %2519 }
 0x2c8   : > { %v1487_v15 = vmul.f32 %v1455_v27, %v1455_v27  ;;  %2531 = vpow2.f32 %v1577_v20  ;;  %v1488_v50 = vmul.f32 %v1456_v4, %v1456_v4  ;;  %v1468_v42 = vmul.f32 %v1423_v43, %v1356_v40  ;;  %v3547_v18 = vpop.eup %2521 }
 0x2c9   : > { %v1499_v3 = vmul.f32 %v1467_v54, %v1467_v54  ;;  %v3899_v2 = vcvt.s32.f32 %v3401_v59  ;;  %v1471_v21 = vmul.f32 %v1433_v24, %v1359_v63  ;;  %2533 = vpow2.f32 %v1557_v32 }
 0x2ca   : > { %v1519_v48 = vmul.f32 -0.5, %v1487_v15  ;;  %v1520_v47 = vmul.f32 -0.5, %v1488_v50  ;;  %v1500_v14 = vmul.f32 %v1468_v42, %v1468_v42  ;;  %v3901_v19 = vcvt.s32.f32 %v3900_v22  ;;  %v3551_v53 = vpop.eup %2523  ;;  %v1403_v63 = vpop.permute.xlu1 %1402 }
 0x2cb   : > { %v1457_v61 = vmul.f32 %v1398_v33, %v3899_v2  ;;  %2535 = vpow2.f32 %v1559_v56  ;;  %v1531_v43 = vmul.f32 -0.5, %v1499_v3  ;;  %v1472_v10 = vmul.f32 %v1433_v24, %v1360_v52 }
 0x2cc   : > { %v1458_v40 = vmul.f32 %v1398_v33, %v3901_v19  ;;  %v1561_v55 = vmul.f32 1.442695, %v1519_v48  ;;  %v1563_v44 = vmul.f32 1.442695, %v1520_v47  ;;  %v1532_v59 = vmul.f32 -0.5, %v1500_v14  ;;  %v3555_v41 = vpop.eup %2525  ;;  %v1443_v33 = vpop.permute.xlu0 %1442 }
 0x2cd   : > { %v1489_v62 = vmul.f32 %v1457_v61, %v1457_v61  ;;  %2537 = vpow2.f32 %v1579_v28  ;;  %v3560_v13 = vmin.u32 %v1313_v38, %v3478_v25  ;;  %v3565_v8 = vmin.u32 %v1322_v0, %v3487_v35 }
 0x2ce   : > { %v1490_v17 = vmul.f32 %v1458_v40, %v1458_v40  ;;  %2539 = vpow2.f32 %v1561_v55  ;;  %v1503_v49 = vmul.f32 %v1471_v21, %v1471_v21  ;;  %v3568_v5 = vmin.u32 %v1325_v7, %v3505_v26  ;;  %v1408_v4 = vpop.permute.xlu1 %1407 }
 0x2cf   : > { %v1521_v39 = vmul.f32 -0.5, %v1489_v62  ;;  %v3570_v52 = vpop.eup %2527  ;;  %2541 = vpow2.f32 %v1563_v44  ;;  %v1585_v31 = vmul.f32 1.442695, %v1531_v43  ;;  %v1608_v25 = vadd.f32 %v3537_v6, %v3533_v12 }
 0x2d0   : > { %v1522_v1 = vmul.f32 -0.5, %v1490_v17  ;;  %v1587_v20 = vmul.f32 1.442695, %v1532_v59  ;;  %v1504_v35 = vmul.f32 %v1472_v10, %v1472_v10  ;;  %v1605_v0 = vadd.f32 %v3547_v18, %v3541_v9 }
 0x2d1   : > { %v1565_v27 = vmul.f32 1.442695, %v1521_v39  ;;  %v3574_v38 = vpop.eup %2529  ;;  %1609 = vadd.xlane.f32.xlu0 %v1608_v25  ;;  %v1459_v26 = vmul.f32 %v1403_v63, %v1347_v34  ;;  %v1460_v7 = vmul.f32 %v1403_v63, %v1348_v60  ;;  %v1357_v32 = vcvt.s32.f32 %v3502_v36 }
 0x2d2   : > { %v1567_v11 = vmul.f32 1.442695, %v1522_v1  ;;  %v3583_v56 = vpop.eup %2531  ;;  %v1535_v15 = vmul.f32 -0.5, %v1503_v49  ;;  %1606 = vadd.xlane.f32.xlu1 %v1605_v0  ;;  %v1358_v54 = vcvt.s32.f32 %v3560_v13  ;;  %v1361_v28 = vcvt.s32.f32 %v3565_v8  ;;  %v1418_v36 = vpop.permute.xlu1 %1417 }
 0x2d3   : > { %2543 = vpow2.f32 %v1565_v27  ;;  %v1491_v50 = vmul.f32 %v1459_v26, %v1459_v26  ;;  %v1492_v42 = vmul.f32 %v1460_v7, %v1460_v7  ;;  %v1611_v51 = vadd.f32 %v3555_v41, %v3551_v53  ;;  %v3589_v30 = vpop.eup %2533 }
 0x2d4   : > { %2545 = vpow2.f32 %v1567_v11  ;;  %v1536_v34 = vmul.f32 -0.5, %v1504_v35  ;;  %v1461_v60 = vmul.f32 %v1408_v4, %v1349_v46  ;;  %v1362_v24 = vcvt.s32.f32 %v3568_v5 }
 0x2d5   : > { %2547 = vpow2.f32 %v1585_v31  ;;  %v3594_v48 = vpop.eup %2535  ;;  %v1523_v3 = vmul.f32 -0.5, %v1491_v50  ;;  %v1524_v2 = vmul.f32 -0.5, %v1492_v42  ;;  %1612 = vadd.xlane.f32.xlu0 %v1611_v51  ;;  %v1462_v61 = vmul.f32 %v1408_v4, %v1350_v23 }
 0x2d6   : > { %2549 = vpow2.f32 %v1587_v20  ;;  %v1614_v21 = vadd.f32 %v3574_v38, %v3570_v52  ;;  %v1593_v47 = vmul.f32 1.442695, %v1535_v15  ;;  %v3902_v14 = vcvt.s32.f32 %v3457_v37  ;;  %v1428_v39 = vpop.permute.xlu1 %1427 }
 0x2d7   : > { %v1493_v57 = vmul.f32 %v1461_v60, %v1461_v60  ;;  %v3903_v46 = vcvt.s32.f32 %v3471_v45  ;;  %v3604_v40 = vpop.eup %2537  ;;  %v1569_v55 = vmul.f32 1.442695, %v1523_v3  ;;  %v1571_v43 = vmul.f32 1.442695, %v1524_v2 }
 0x2d8   : > { %v1475_v22 = vmul.f32 %v1443_v33, %v3902_v14  ;;  %v1494_v62 = vmul.f32 %v1462_v61, %v1462_v61  ;;  %1615 = vadd.xlane.f32.xlu1 %v1614_v21  ;;  %v1466_v23 = vmul.f32 %v1418_v36, %v3904_v58  ;;  %v3608_v44 = vpop.eup %2539  ;;  %v1595_v59 = vmul.f32 1.442695, %v1536_v34 }
 0x2d9   : > { %v1465_v19 = vmul.f32 %v1418_v36, %v3903_v46  ;;  %v3905_v17 = vcvt.s32.f32 %v3459_v29  ;;  %v1525_v10 = vmul.f32 -0.5, %v1493_v57  ;;  %v3612_v45 = vpop.eup %2541  ;;  %2551 = vpow2.f32 %v1569_v55 }
 0x2da   : > { %v1526_v13 = vmul.f32 -0.5, %v1494_v62  ;;  %v1498_v8 = vmul.f32 %v1466_v23, %v1466_v23  ;;  %v1617_v1 = vadd.f32 %v3594_v48, %v3589_v30  ;;  %2553 = vpow2.f32 %v1571_v43  ;;  %v1438_v7 = vpop.permute.xlu1 %1437 }
 0x2db   : > { %v1476_v37 = vmul.f32 %v1443_v33, %v3905_v17  ;;  %v1497_v63 = vmul.f32 %v1465_v19, %v1465_v19  ;;  %v1573_v16 = vmul.f32 1.442695, %v1525_v10  ;;  %v1469_v5 = vmul.f32 %v1428_v39, %v1357_v32 }
 0x2dc   : > { %v1507_v27 = vmul.f32 %v1475_v22, %v1475_v22  ;;  %v1575_v29 = vmul.f32 1.442695, %v1526_v13  ;;  %v1530_v25 = vmul.f32 -0.5, %v1498_v8  ;;  %1618 = vadd.xlane.f32.xlu0 %v1617_v1  ;;  %v1470_v20 = vmul.f32 %v1428_v39, %v1358_v54 }
 0x2dd   : > { %v1529_v49 = vmul.f32 -0.5, %v1497_v63  ;;  %v3616_v31 = vpop.eup %2543  ;;  %v1508_v35 = vmul.f32 %v1476_v37, %v1476_v37  ;;  %v1501_v4 = vmul.f32 %v1469_v5, %v1469_v5  ;;  %v1620_v26 = vadd.f32 %v3612_v45, %v3608_v44 }
 0x2de   : > { %v3618_v11 = vpop.eup %2545  ;;  %2555 = vpow2.f32 %v1573_v16  ;;  %v1583_v32 = vmul.f32 1.442695, %v1530_v25  ;;  %v1502_v50 = vmul.f32 %v1470_v20, %v1470_v20  ;;  %v1473_v42 = vmul.f32 %v1438_v7, %v1361_v28 }
 0x2df   : > { %v1581_v0 = vmul.f32 1.442695, %v1529_v49  ;;  %v3622_v15 = vpop.eup %2547  ;;  %2557 = vpow2.f32 %v1575_v29  ;;  %v1533_v51 = vmul.f32 -0.5, %v1501_v4  ;;  %1621 = vadd.xlane.f32.xlu1 %v1620_v26  ;;  %v1474_v54 = vmul.f32 %v1438_v7, %v1362_v24 }
 0x2e0   : > { %v3624_v33 = vpop.eup %2549  ;;  %v1623_v34 = vadd.f32 %v3618_v11, %v3616_v31  ;;  %v1539_v60 = vmul.f32 -0.5, %v1507_v27  ;;  %v1534_v36 = vmul.f32 -0.5, %v1502_v50  ;;  %v1505_v3 = vmul.f32 %v1473_v42, %v1473_v42 }
 0x2e1   : > { %2559 = vpow2.f32 %v1581_v0  ;;  %v1540_v2 = vmul.f32 -0.5, %v1508_v35  ;;  %v1589_v61 = vmul.f32 1.442695, %v1533_v51  ;;  %v1506_v21 = vmul.f32 %v1474_v54, %v1474_v54 }
 0x2e2   : > { %2561 = vpow2.f32 %v1583_v32  ;;  %1624 = vadd.xlane.f32.xlu0 %v1623_v34  ;;  %v1591_v28 = vmul.f32 1.442695, %v1534_v36  ;;  %v1537_v14 = vmul.f32 -0.5, %v1505_v3  ;;  %v1601_v24 = vmul.f32 1.442695, %v1539_v60 }
 0x2e3   : > { %2563 = vpow2.f32 %v1593_v47  ;;  %v1538_v22 = vmul.f32 -0.5, %v1506_v21  ;;  %v3628_v57 = vpop.eup %2551  ;;  %v1603_v55 = vmul.f32 1.442695, %v1540_v2  ;;  %v1632_v17 = vadd.f32 %v3604_v40, %v3583_v56 }
 0x2e4   : > { %2565 = vpow2.f32 %v1589_v61  ;;  %v1597_v46 = vmul.f32 1.442695, %v1537_v14  ;;  %v3630_v19 = vpop.eup %2553  ;;  %v1638_v8 = vadd.f32 %v3624_v33, %v3622_v15 }
 0x2e5   : > { %2567 = vpow2.f32 %v1591_v28  ;;  %v1599_v43 = vmul.f32 1.442695, %v1538_v22  ;;  %v1626_v62 = vadd.f32 %v3630_v19, %v3628_v57 }
 0x2e6   : > { %2569 = vpow2.f32 %v1595_v59 }
 0x2e7   : > { %2571 = vpow2.f32 %v1597_v46  ;;  %1627 = vadd.xlane.f32.xlu1 %v1626_v62 }
 0x2e8   : > { %2573 = vpow2.f32 %v1599_v43  ;;  %v3634_v47 = vpop.eup %2555 }
 0x2e9   : > { %2575 = vpow2.f32 %v1601_v24  ;;  %v3636_v58 = vpop.eup %2557 }
 0x2ea   : > { %2577 = vpow2.f32 %v1603_v55  ;;  %v1629_v59 = vadd.f32 %v3636_v58, %v3634_v47 }
 0x2eb   : > { %v3638_v23 = vpop.eup %2559  ;;  %1633 = vadd.xlane.f32.xlu1 %v1632_v17 }
 0x2ec   : > { %v3644_v37 = vpop.eup %2561  ;;  %1630 = vadd.xlane.f32.xlu0 %v1629_v59 }
 0x2ed   : > { %v3646_v10 = vpop.eup %2563  ;;  %v1635_v63 = vadd.f32 %v3644_v37, %v3638_v23 }
 0x2ee   : > { %v3650_v39 = vpop.eup %2565 }
 0x2ef   : > { %v3652_v13 = vpop.eup %2567  ;;  %1639 = vadd.xlane.f32.xlu1 %v1638_v8 }
 0x2f0   : > { %v3656_v1 = vpop.eup %2569  ;;  %1636 = vadd.xlane.f32.xlu0 %v1635_v63  ;;  %v1641_v49 = vadd.f32 %v3652_v13, %v3650_v39 }
 0x2f1   : > { %v3658_v16 = vpop.eup %2571  ;;  %v1644_v29 = vadd.f32 %v3656_v1, %v3646_v10 }
 0x2f2   : > { %v3662_v5 = vpop.eup %2573 }
 0x2f3   : > { %v3664_v27 = vpop.eup %2575  ;;  %1645 = vadd.xlane.f32.xlu1 %v1644_v29  ;;  %v1647_v20 = vadd.f32 %v3662_v5, %v3658_v16 }
 0x2f4   : > { %v3668_v25 = vpop.eup %2577  ;;  %1642 = vadd.xlane.f32.xlu0 %v1641_v49 }
 0x2f5   : > { %v1650_v35 = vadd.f32 %v3668_v25, %v3664_v27 }
 0x2f7   : > { %1651 = vadd.xlane.f32.xlu1 %v1650_v35 }
 0x2f8   : > { %1648 = vadd.xlane.f32.xlu0 %v1647_v20 }
 0x35c   : > { %v2177_v4 = vpop.f32.mrb[0].mxu1 }
 0x35d   : > { %v2178_v7 = vpop.f32.mrb[1].mxu1 }
 0x35e   : > { %v1610_v0 = vpop.xlane.xlu0 %1609  ;;  %v2179_v32 = vadd.f32 %v2178_v7, %v2177_v4  ;;  %v2180_v50 = vpop.f32.mrb[2].mxu1 }
 0x35f   : > { %2579 = vrcp.f32 %v1610_v0  ;;  %v1607_v26 = vpop.xlane.xlu1 %1606  ;;  %v2181_v42 = vpop.f32.mrb[3].mxu1 }
 0x360   : > { %2581 = vrcp.f32 %v1607_v26  ;;  %1157 = vst [vmem:[%s3680_s29] sm:$0xff] %v2179_v32  ;;  %v2182_v54 = vadd.f32 %v2181_v42, %v2180_v50 }
 0x362   : > { %v1613_v51 = vpop.xlane.xlu0 %1612  ;;  %1158 = vst [vmem:[%s3680_s29 + $0x8] sm:$0xff] %v2182_v54 }
 0x363   : > { %2583 = vrcp.f32 %v1613_v51 }
 0x364   : > { %v2183_v60 = vpop.f32.mrb[4].mxu1 }
 0x365   : > { %v1616_v34 = vpop.xlane.xlu1 %1615  ;;  %v2184_v36 = vpop.f32.mrb[5].mxu1 }
 0x366   : > { %2585 = vrcp.f32 %v1616_v34  ;;  %v2185_v2 = vadd.f32 %v2184_v36, %v2183_v60  ;;  %v2186_v61 = vpop.f32.mrb[6].mxu1 }
 0x367   : > { %v2187_v28 = vpop.f32.mrb[7].mxu1 }
 0x368   : > { %1159 = vst [vmem:[%s3680_s29 + $0x10] sm:$0xff] %v2185_v2  ;;  %v2188_v46 = vadd.f32 %v2187_v28, %v2186_v61 }
 0x369   : > { %v1619_v3 = vpop.xlane.xlu0 %1618  ;;  %v2580_v21 = vpop.eup %2579 }
 0x36a   : > { %2587 = vrcp.f32 %v1619_v3  ;;  %v2582_v14 = vpop.eup %2581  ;;  %v1671_v22 = vmul.f32 %v2580_v21, %v3533_v12  ;;  %v1672_v24 = vmul.f32 %v2580_v21, %v3537_v6  ;;  %1160 = vst [vmem:[%s3680_s29 + $0x18] sm:$0xff] %v2188_v46 }
 0x36b   : > { %v1669_v55 = vmul.f32 %v2582_v14, %v3541_v9  ;;  %v1670_v43 = vmul.f32 %v2582_v14, %v3547_v18 }
 0x36c   : > { %v1622_v62 = vpop.xlane.xlu1 %1621  ;;  %v2145_v17 = vpack.c.bf16 %v1672_v24, %v1671_v22  ;;  %v2189_v9 = vpop.f32.mrb[8].mxu1 }
 0x36d   : > { %2589 = vrcp.f32 %v1622_v62  ;;  %v2584_v59 = vpop.eup %2583  ;;  %v2144_v63 = vpack.c.bf16 %v1670_v43, %v1669_v55  ;;  %v2190_v49 = vpop.f32.mrb[9].mxu1 }
 0x36e   : > { %1798 = vst [vmem:[%s3692_s10 + $0x8] sm:$0xff] %v2145_v17  ;;  %v1673_v12 = vmul.f32 %v2584_v59, %v3551_v53  ;;  %v1674_v6 = vmul.f32 %v2584_v59, %v3555_v41  ;;  %v2191_v0 = vadd.f32 %v2190_v49, %v2189_v9  ;;  %v2192_v4 = vpop.f32.mrb[10].mxu1 }
 0x36f   : > { %v1625_v8 = vpop.xlane.xlu0 %1624  ;;  %1797 = vst [vmem:[%s3692_s10] sm:$0xff] %v2144_v63  ;;  %v2193_v26 = vpop.f32.mrb[11].mxu1 }
 0x370   : > { %2591 = vrcp.f32 %v1625_v8  ;;  %v2586_v18 = vpop.eup %2585  ;;  %v2146_v29 = vpack.c.bf16 %v1674_v6, %v1673_v12  ;;  %1161 = vst [vmem:[%s3680_s29 + $0x20] sm:$0xff] %v2191_v0  ;;  %v2194_v53 = vadd.f32 %v2193_v26, %v2192_v4 }
 0x371   : > { %v1675_v20 = vmul.f32 %v2586_v18, %v3570_v52  ;;  %v1676_v35 = vmul.f32 %v2586_v18, %v3574_v38 }
 0x372   : > { %1799 = vst [vmem:[%s3692_s10 + $0x10] sm:$0xff] %v2146_v29  ;;  %1162 = vst [vmem:[%s3680_s29 + $0x28] sm:$0xff] %v2194_v53 }
 0x373   : > { %v2147_v7 = vpack.c.bf16 %v1676_v35, %v1675_v20 }
 0x374   : > { %v2588_v41 = vpop.eup %2587  ;;  %v1628_v42 = vpop.xlane.xlu1 %1627 }
 0x375   : > { %1800 = vst [vmem:[%s3692_s10 + $0x18] sm:$0xff] %v2147_v7  ;;  %v1677_v32 = vmul.f32 %v2588_v41, %v3589_v30  ;;  %v1678_v50 = vmul.f32 %v2588_v41, %v3594_v48  ;;  %2593 = vrcp.f32 %v1628_v42  ;;  %v2195_v38 = vpop.f32.mrb[12].mxu1 }
 0x376   : > { %v2196_v60 = vpop.f32.mrb[13].mxu1 }
 0x377   : > { %v2590_v52 = vpop.eup %2589  ;;  %v2148_v51 = vpack.c.bf16 %v1678_v50, %v1677_v32  ;;  %v2197_v2 = vadd.f32 %v2196_v60, %v2195_v38  ;;  %v2198_v28 = vpop.f32.mrb[14].mxu1 }
 0x378   : > { %v1679_v54 = vmul.f32 %v2590_v52, %v3608_v44  ;;  %v1680_v34 = vmul.f32 %v2590_v52, %v3612_v45  ;;  %v1634_v30 = vpop.xlane.xlu1 %1633  ;;  %v2199_v44 = vpop.f32.mrb[15].mxu1 }
 0x379   : > { %1801 = vst [vmem:[%s3692_s10 + $0x20] sm:$0xff] %v2148_v51  ;;  %v1631_v3 = vpop.xlane.xlu0 %1630  ;;  %1163 = vst [vmem:[%s3680_s29 + $0x30] sm:$0xff] %v2197_v2  ;;  %v2200_v14 = vadd.f32 %v2199_v44, %v2198_v28 }
 0x37a   : > { %v2592_v36 = vpop.eup %2591  ;;  %v2149_v48 = vpack.c.bf16 %v1680_v34, %v1679_v54  ;;  %2595 = vrcp.f32 %v1631_v3 }
 0x37b   : > { %v1681_v61 = vmul.f32 %v2592_v36, %v3616_v31  ;;  %v1682_v21 = vmul.f32 %v2592_v36, %v3618_v11  ;;  %2597 = vrcp.f32 %v1634_v30  ;;  %1164 = vst [vmem:[%s3680_s29 + $0x38] sm:$0xff] %v2200_v14 }
 0x37c   : > { %1802 = vst [vmem:[%s3692_s10 + $0x28] sm:$0xff] %v2149_v48  ;;  %v1640_v24 = vpop.xlane.xlu1 %1639  ;;  %v2201_v46 = vpop.f32.mrb[16].mxu1 }
 0x37d   : > { %v2150_v45 = vpack.c.bf16 %v1682_v21, %v1681_v61  ;;  %v1637_v22 = vpop.xlane.xlu0 %1636  ;;  %v2202_v31 = vpop.f32.mrb[17].mxu1 }
 0x37e   : > { %2599 = vrcp.f32 %v1637_v22  ;;  %v2203_v59 = vadd.f32 %v2202_v31, %v2201_v46  ;;  %v2204_v63 = vpop.f32.mrb[18].mxu1 }
 0x37f   : > { %1803 = vst [vmem:[%s3692_s10 + $0x30] sm:$0xff] %v2150_v45  ;;  %2601 = vrcp.f32 %v1640_v24  ;;  %v2594_v55 = vpop.eup %2593  ;;  %v2205_v12 = vpop.f32.mrb[19].mxu1 }
 0x380   : > { %v1683_v11 = vmul.f32 %v2594_v55, %v3628_v57  ;;  %v1684_v43 = vmul.f32 %v2594_v55, %v3630_v19  ;;  %v1646_v17 = vpop.xlane.xlu1 %1645  ;;  %1165 = vst [vmem:[%s3680_s29 + $0x40] sm:$0xff] %v2203_v59  ;;  %v2206_v9 = vadd.f32 %v2205_v12, %v2204_v63 }
 0x381   : > { %v1643_v62 = vpop.xlane.xlu0 %1642 }
 0x382   : > { %2603 = vrcp.f32 %v1643_v62  ;;  %v2151_v8 = vpack.c.bf16 %v1684_v43, %v1683_v11  ;;  %1166 = vst [vmem:[%s3680_s29 + $0x48] sm:$0xff] %v2206_v9 }
 0x383   : > { %2605 = vrcp.f32 %v1646_v17 }
 0x384   : > { %v2596_v6 = vpop.eup %2595  ;;  %1804 = vst [vmem:[%s3692_s10 + $0x38] sm:$0xff] %v2151_v8  ;;  %v1652_v29 = vpop.xlane.xlu1 %1651 }
 0x385   : > { %v2598_v18 = vpop.eup %2597  ;;  %v1685_v49 = vmul.f32 %v2596_v6, %v3634_v47  ;;  %v1686_v57 = vmul.f32 %v2596_v6, %v3636_v58  ;;  %v1649_v19 = vpop.xlane.xlu0 %1648 }
 0x386   : > { %v1687_v20 = vmul.f32 %v2598_v18, %v3583_v56  ;;  %v1688_v35 = vmul.f32 %v2598_v18, %v3604_v40  ;;  %2607 = vrcp.f32 %v1649_v19  ;;  %v2207_v4 = vpop.f32.mrb[20].mxu1 }
 0x387   : > { %v2152_v0 = vpack.c.bf16 %v1686_v57, %v1685_v49  ;;  %2609 = vrcp.f32 %v1652_v29  ;;  %v2208_v47 = vpop.f32.mrb[21].mxu1 }
 0x388   : > { %v2600_v26 = vpop.eup %2599  ;;  %v2153_v7 = vpack.c.bf16 %v1688_v35, %v1687_v20  ;;  %v2209_v41 = vadd.f32 %v2208_v47, %v2207_v4  ;;  %v2210_v40 = vpop.f32.mrb[22].mxu1 }
 0x389   : > { %v2602_v53 = vpop.eup %2601  ;;  %1805 = vst [vmem:[%s3692_s10 + $0x40] sm:$0xff] %v2152_v0  ;;  %v1689_v58 = vmul.f32 %v2600_v26, %v3638_v23  ;;  %v1690_v56 = vmul.f32 %v2600_v26, %v3644_v37  ;;  %v2211_v42 = vpop.f32.mrb[23].mxu1 }
 0x38a   : > { %1806 = vst [vmem:[%s3692_s10 + $0x48] sm:$0xff] %v2153_v7  ;;  %v1691_v32 = vmul.f32 %v2602_v53, %v3622_v15  ;;  %v1692_v50 = vmul.f32 %v2602_v53, %v3624_v33  ;;  %1167 = vst [vmem:[%s3680_s29 + $0x50] sm:$0xff] %v2209_v41  ;;  %v2212_v51 = vadd.f32 %v2211_v42, %v2210_v40 }
 0x38b   : > { %v2154_v52 = vpack.c.bf16 %v1690_v56, %v1689_v58 }
 0x38c   : > { %v2604_v38 = vpop.eup %2603  ;;  %v2155_v23 = vpack.c.bf16 %v1692_v50, %v1691_v32  ;;  %1168 = vst [vmem:[%s3680_s29 + $0x58] sm:$0xff] %v2212_v51  ;;  %v2213_v36 = vpop.f32.mrb[24].mxu1 }
 0x38d   : > { %v2606_v54 = vpop.eup %2605  ;;  %1807 = vst [vmem:[%s3692_s10 + $0x50] sm:$0xff] %v2154_v52  ;;  %v1693_v37 = vmul.f32 %v2604_v38, %v3650_v39  ;;  %v1694_v34 = vmul.f32 %v2604_v38, %v3652_v13  ;;  %v2214_v2 = vpop.f32.mrb[25].mxu1 }
 0x38e   : > { %1808 = vst [vmem:[%s3692_s10 + $0x58] sm:$0xff] %v2155_v23  ;;  %v1695_v15 = vmul.f32 %v2606_v54, %v3646_v10  ;;  %v1696_v33 = vmul.f32 %v2606_v54, %v3656_v1  ;;  %v2215_v61 = vadd.f32 %v2214_v2, %v2213_v36  ;;  %v2216_v10 = vpop.f32.mrb[26].mxu1 }
 0x38f   : > { %v2156_v60 = vpack.c.bf16 %v1694_v34, %v1693_v37  ;;  %v2217_v28 = vpop.f32.mrb[27].mxu1 }
 0x390   : > { %v2608_v3 = vpop.eup %2607  ;;  %v2157_v30 = vpack.c.bf16 %v1696_v33, %v1695_v15  ;;  %1169 = vst [vmem:[%s3680_s29 + $0x60] sm:$0xff] %v2215_v61 }
 0x391   : > { %v2610_v48 = vpop.eup %2609  ;;  %1809 = vst [vmem:[%s3692_s10 + $0x60] sm:$0xff] %v2156_v60  ;;  %v1697_v39 = vmul.f32 %v2608_v3, %v3658_v16  ;;  %v1698_v13 = vmul.f32 %v2608_v3, %v3662_v5  ;;  %v2218_v5 = vadd.f32 %v2217_v28, %v2216_v10 }
 0x392   : > { %1810 = vst [vmem:[%s3692_s10 + $0x68] sm:$0xff] %v2157_v30  ;;  %v1699_v1 = vmul.f32 %v2610_v48, %v3664_v27  ;;  %v1700_v21 = vmul.f32 %v2610_v48, %v3668_v25 }
 0x393   : > { %v2158_v16 = vpack.c.bf16 %v1698_v13, %v1697_v39  ;;  %1170 = vst [vmem:[%s3680_s29 + $0x68] sm:$0xff] %v2218_v5 }
 0x394   : > { %v2159_v44 = vpack.c.bf16 %v1700_v21, %v1699_v1 }
 0x395   : > { %1811 = vst [vmem:[%s3692_s10 + $0x70] sm:$0xff] %v2158_v16 }
 0x396   : > { %1812 = vst [vmem:[%s3692_s10 + $0x78] sm:$0xff] %v2159_v44 }
 0x397   : > { %2654 = shalt.err (!%p2651_p11)
}
 0x398   : > { %s2655_s27 = scalar_lea.hbm %s3752_s8, 2048  ;;  %s2659_s7 = scalar_lea.hbm %s3869_s5, 8192 }
 0x399   : > { %p2656_p13 = scmp.ne.s32.totalorder %s3752_s8, %s2655_s27  ;;  %p2660_p10 = scmp.lt.u32.totalorder %s3752_s8, %s3869_s5 }
 0x39a   : > { %p2661_p12 = scmp.lt.u32.totalorder %s2659_s7, %s2655_s27  ;;  %p2663_p7 = scmp.lt.u32.totalorder %s2655_s27, %s3752_s8 }
 0x39b   : > { %p2657_p5 = pnand %p2656_p13, %p3906_p4 }
 0x39c   : > { %p2662_p2 = por %p2661_p12, %p2660_p10 }
 0x39d   : > { %p2658_p8 = pneg %p2657_p5 }
 0x39e   : > { %p2664_p0 = por %p2663_p7, %p2662_p2 }
 0x3a0   : > { %p2665_p1 = pnand %p2664_p0, %p2658_p8 }
 0x3a2   : > { %2668 = shalt.err (!%p2665_p1)
}
 0x3a3   : > { %s2802_s11 = smov 128   ;;  %s2803_s13 = smov 8   ;;  %v2219_v27 = vpop.f32.mrb[28].mxu1 }
 0x3a4   : > { %2228 = dma.vmem_to_hbm [thread:$0]  (%p3906_p4), %s3754_s12, 2048, %s3752_s8, %s1819_s6, %s2802_s11, %s2802_s11, %s2803_s13   ;;  %v2220_v25 = vpop.f32.mrb[29].mxu1 }
 0x3a5   : > { %s2135_s27 = sshll.u32 %s3759_s25, 7  ;;  %s1834_s10 = sshll.u32 %s3680_s29, 4  ;;  %v2221_v45 = vadd.f32 %v2220_v25, %v2219_v27  ;;  %v2222_v14 = vpop.f32.mrb[30].mxu1  ;;  %s3797_s10 = int_to_ptr.vmem [resolvable:$true] %s1834_s10 }
 0x3a6   : > { %s3794_s24 = scalar_lea.hbm %s3868_s4, %s2135_s27  ;;  %v2223_v22 = vpop.f32.mrb[31].mxu1  ;;  %s1814_s12 = scalar_lea.sflag [#allocation4], %s3675_s9 }
 0x3a7   : > { %1171 = vst [vmem:[%s3680_s29 + $0x70] sm:$0xff] %v2221_v45  ;;  %v2224_v24 = vadd.f32 %v2223_v22, %v2222_v14  ;;  %s2669_s8 = scalar_lea.vmem %s3797_s10, 2048  ;;  %s2804_s25 = smov [#allocation5]  }
 0x3a8   : > { %p2670_p6 = scmp.ne.s32.totalorder %s3797_s10, %s2669_s8  ;;  %s2673_s6 = sshll.u32 %s2804_s25, 4  ;;  %s2674_s6 = int_to_ptr.vmem [resolvable:$false] %s2673_s6 }
 0x3a9   : > { %1172 = vst [vmem:[%s3680_s29 + $0x78] sm:$0xff] %v2224_v24  ;;  %s2675_s14 = scalar_lea.vmem %s2674_s6, 4096  ;;  %p2676_p11 = scmp.lt.s32.totalorder %s3797_s10, %s2674_s6 }
 0x3aa   : > { %p2671_p9 = pnand %p2670_p6, %p3906_p4  ;;  %p2677_p13 = scmp.lt.s32.totalorder %s2675_s14, %s2669_s8 }
 0x3ac   : > { %p2672_p3 = pneg %p2671_p9  ;;  %p2678_p5 = por %p2677_p13, %p2676_p11 }
 0x3ae   : > { %p2679_p8 = pnand %p2678_p5, %p2672_p3 }
 0x3b0   : > { %2682 = shalt.err (!%p2679_p8)
}
 0x3b1   : > { %s2683_s29 = scalar_lea.hbm %s3794_s24, 2048  ;;  %s2687_s7 = scalar_lea.hbm %s3868_s4, 8192 }
 0x3b2   : > { %p2684_p10 = scmp.ne.s32.totalorder %s3794_s24, %s2683_s29  ;;  %p2688_p7 = scmp.lt.u32.totalorder %s3794_s24, %s3868_s4 }
 0x3b3   : > { %p2689_p0 = scmp.lt.u32.totalorder %s2687_s7, %s2683_s29  ;;  %p2691_p6 = scmp.lt.u32.totalorder %s2683_s29, %s3794_s24 }
 0x3b4   : > { %p2685_p12 = pnand %p2684_p10, %p3906_p4 }
 0x3b5   : > { %p2690_p1 = por %p2689_p0, %p2688_p7 }
 0x3b6   : > { %p2686_p2 = pneg %p2685_p12 }
 0x3b7   : > { %p2692_p9 = por %p2691_p6, %p2690_p1 }
 0x3b9   : > { %p2693_p3 = pnand %p2692_p9, %p2686_p2 }
 0x3bb   : > { %2696 = shalt.err (!%p2693_p3)
}
 0x3bc   : > { %2227 = dma.vmem_to_hbm [thread:$0]  (%p3906_p4), %s3797_s10, 2048, %s3794_s24, %s1814_s12, %s2802_s11, %s2802_s11, %s2803_s13  }
 0x3bd PF: > { %p2243_p11 = scmp.ge.s32.totalorder %s2795_s28, 2  ;;  %s1868_s8 = sand.u32 1, %s2755_s18  }
 0x3be   : > { %p3907_p13 = scmp.ne.s32.totalorder %s3881_s21, 0  ;;  %s1869_s14 = scalar_lea.sflag [#allocation4], %s1868_s8 }
 0x3c0   : > { %p2236_p5 = pnand %p2243_p11, %p3907_p13 }
 0x3c2   : > { %2746 = dma.done.wait (!%p2236_p5), %s1869_s14, 2048  }
 0x3c3   : > { %2748 = vsyncadd (!%p2236_p5), %s1869_s14, 4294965248  ;;  %s1878_s15 = scalar_lea.sflag [#allocation7], %s1868_s8 }
 0x3c4   : > { %2750 = dma.done.wait (!%p2236_p5), %s1878_s15, 2048  }
 0x3c5   : > { %2752 = vsyncadd (!%p2236_p5), %s1878_s15, 4294965248  ;;  %s25_s28 = sadd.s32 1, %s2795_s28   ;;  %s3908_s25 = sld [smem:[#allocation11_spill]] }
 0x3c6   : > { %p22_p8 = scmp.ge.s32.totalorder %s25_s28, 6   ;;  %s3909_s9 = sld [smem:[#allocation12_spill]] }
 0x3c7   : > { %s3910_s27 = sld [smem:[#allocation13_spill]]  ;;  %s3911_s18 = smov %s2759_s19 }
 0x3c8   : > { %s3912_s19 = smov %s2763_s20  ;;  %s3913_s20 = smov %s2925_s17 }
 0x3c9   : > { %s3914_s21 = smov %s2771_s22  ;;  %s3915_s22 = smov %s2775_s23 }
 0x3ca   : > { %s3916_s23 = smov %s2922_s16  ;;  %s3917_s24 = smov %s2787_s26 }
 0x3cb   :  { %24 = sbr.rel (!%p22_p8) target bundleno = 11 (0xb), region = 107 }
 0x3cc   : > { %s3918_s26 = smov %s3909_s9 }
 0x3d2   :  { %1883 = vsyncpa [#allocation3], 1 }
 0x3d3   :  { %1885 = vsyncpa [#allocation3 + $0x1], 1 }
 0x3d4   :  { %1886 = vsyncpa [#allocation4], 1 }
 0x3d5   :  { %1888 = vsyncpa [#allocation4 + $0x1], 1 }
 0x3d6   :  { %1889 = vsyncpa [#allocation7], 1 }
 0x3d7   :  { %1891 = vsyncpa [#allocation7 + $0x1], 1 }

</bundles_post_ra>
